<compile_context>
chip_gen: v5e
topology: v5e:2x2
jax: 0.10.0
libtpu: 0.0.40
codegen_flags: <defaults>
</compile_context>

<pallas_src>
import functools

import jax
import jax.numpy as jnp
from jax import lax
from jax.experimental import pallas as pl
from jax.experimental.pallas import tpu as pltpu


# ------------------------------ Pallas kernel ------------------------------- #

def _fused_conv_bn_relu_kernel(x_ref, w_ref, gb_ref, o_ref, *,
                               B, W, HW, Cout, K, pad, eps):
    """Fused grouped KxK conv (stride 1) + BatchNorm (batch stats) + ReLU.

    x_ref  : (B, Cin, Lpad)     bf16  height-padded, flattened (h, w) spatial,
                                      lane axis padded to a multiple of 128
    w_ref  : (K*K, Cout, Cin)   bf16  per-tap group-block-diagonal weights
    gb_ref : (2, Cout, 1)       f32   [gamma; beta]
    o_ref  : (B, Cout, HW)      f32   output in NCHW element order
    """
    # Static per-lane width coordinate of each flattened (h, w) output position.
    wcol = lax.broadcasted_iota(jnp.int32, (1, HW), 1) % W
    # Width-validity masks for the horizontally shifted taps (kill row wrap-around).
    masks = {}
    for kw in range(K):
        dx = kw - pad
        if dx == 0:
            continue
        valid = (wcol >= -dx) if dx < 0 else (wcol < W - dx)
        masks[kw] = valid.astype(jnp.bfloat16)

    w_all = w_ref[...]                                   # (K*K, Cout, Cin) bf16

    # ---- grouped conv: per batch, K*K small matmuls, f32 accumulation ----
    convs = []
    for b in range(B):
        x_b = x_ref[b]                                   # (Cin, Lpad) bf16
        acc = jnp.zeros((Cout, HW), jnp.float32)
        for kh in range(K):
            for kw in range(K):
                off = kh * W + kw                        # static lane offset
                slab = x_b[:, off:off + HW]              # (Cin, HW) shifted window
                if kw in masks:
                    slab = slab * masks[kw]
                acc = acc + jnp.dot(w_all[kh * K + kw], slab,
                                    preferred_element_type=jnp.float32)
        convs.append(acc)                                # (Cout, HW) f32

    # ---- per-channel BatchNorm statistics (two-pass, f32) ----
    # Channels live on the sublane axis -> stats are plain lane reductions.
    n = float(B * HW)
    sum_c = jnp.zeros((Cout, 1), jnp.float32)
    for a in convs:
        sum_c = sum_c + jnp.sum(a, axis=1, keepdims=True)
    mean = sum_c / n                                     # (Cout, 1)

    ssq = jnp.zeros((Cout, 1), jnp.float32)
    for a in convs:
        c = a - mean
        ssq = ssq + jnp.sum(c * c, axis=1, keepdims=True)
    var = ssq / n                                        # (Cout, 1), biased (training)

    scale = gb_ref[0] * lax.rsqrt(var + eps)             # (Cout, 1)
    beta = gb_ref[1]                                     # (Cout, 1)

    # ---- normalize + ReLU, lane-dense stores in NCHW order ----
    for b in range(B):
        y = (convs[b] - mean) * scale + beta
        o_ref[b] = jnp.maximum(y, 0.0).astype(o_ref.dtype)


# -------------------------------- Wrapper ------------------------------------ #

def resnext_conv_layer(x_nchw, weight, gamma, beta, *, groups, stride=1,
                       eps=1e-5):
    """Forward of ResNextConvLayer.  x_nchw: (B, Cin, H, W) float32."""
    assert stride == 1, "TODO(synk): stride > 1 not implemented"
    B, Cin, H, W = x_nchw.shape
    Cout, Cin_g, K, _ = weight.shape
    assert Cin_g == Cin // groups and Cout % groups == 0
    Cout_g = Cout // groups
    pad = K // 2
    Hp = H + 2 * pad
    HW = H * W
    L = Hp * W
    # Flat length padded so every tap window [off, off + HW) is in bounds and the
    # lane axis is a multiple of 128.
    Lpad = ((L + 2 * pad + 127) // 128) * 128

    # Layout glue (tiny): pad height only, flatten (h, w), shift by `pad` zeros so
    # all tap offsets are non-negative, pad lanes to 128-alignment, cast to bf16.
    xflat = jnp.pad(x_nchw, ((0, 0), (0, 0), (pad, pad), (0, 0)))   # (B,Cin,Hp,W)
    xflat = xflat.reshape(B, Cin, L)
    xflat = jnp.pad(xflat, ((0, 0), (0, 0), (pad, Lpad - L - pad)))
    xflat = xflat.astype(jnp.bfloat16)

    # Compact per-tap group-block-diagonal weight: (K*K, Cout, Cin) bf16.
    w_r = weight.reshape(groups, Cout_g, Cin_g, K, K)
    eye_g = jnp.eye(groups, dtype=weight.dtype)
    wt = jnp.einsum('gh,goikl->klgohi', eye_g, w_r).reshape(K * K, Cout, Cin)
    wt = wt.astype(jnp.bfloat16)

    # gamma/beta in one tiny operand, shaped for sublane broadcast.
    gb = jnp.stack([gamma, beta]).reshape(2, Cout, 1).astype(jnp.float32)

    kernel = functools.partial(_fused_conv_bn_relu_kernel, B=B, W=W, HW=HW,
                               Cout=Cout, K=K, pad=pad, eps=eps)

    # Truthful cost estimate: actual MXU work (incl. group-zero padding) and the
    # bytes actually DMA'd.
    mxu_flops = 2 * B * K * K * Cout * Cin * HW
    bytes_accessed = (xflat.size * 2 + wt.size * 2 + gb.size * 4
                      + B * Cout * HW * 4)

    out = pl.pallas_call(
        kernel,
        out_shape=jax.ShapeDtypeStruct((B, Cout, HW), jnp.float32),
        grid_spec=pltpu.PrefetchScalarGridSpec(
            num_scalar_prefetch=0,
            grid=(1,),
            in_specs=[
                pl.BlockSpec((B, Cin, Lpad), lambda i: (0, 0, 0)),
                pl.BlockSpec((K * K, Cout, Cin), lambda i: (0, 0, 0)),
                pl.BlockSpec((2, Cout, 1), lambda i: (0, 0, 0)),
            ],
            out_specs=pl.BlockSpec((B, Cout, HW), lambda i: (0, 0, 0)),
        ),
        compiler_params=pltpu.CompilerParams(
            dimension_semantics=("arbitrary",)),
        cost_estimate=pl.CostEstimate(flops=mxu_flops, transcendentals=Cout,
                                      bytes_accessed=bytes_accessed),
    )(xflat, wt, gb)

    # Output is already in NCHW element order: reshape only, no transpose op.
    return out.reshape(B, Cout, H, W)


# ------------------------------- Reference ----------------------------------- #

def _reference(x_nchw, weight, gamma, beta, *, groups, eps=1e-5,
               conv_dtype=jnp.float32):
    pad = weight.shape[2] // 2
    conv = lax.conv_general_dilated(
        x_nchw.astype(conv_dtype), weight.astype(conv_dtype),
        window_strides=(1, 1), padding=((pad, pad), (pad, pad)),
        dimension_numbers=("NCHW", "OIHW", "NCHW"),
        feature_group_count=groups,
        preferred_element_type=jnp.float32)
    conv = conv.astype(jnp.float32)
    mean = conv.mean(axis=(0, 2, 3), keepdims=True)
    var = ((conv - mean) ** 2).mean(axis=(0, 2, 3), keepdims=True)
    y = (conv - mean) * lax.rsqrt(var + eps)
    y = y * gamma.reshape(1, -1, 1, 1) + beta.reshape(1, -1, 1, 1)
    return jnp.maximum(y, 0.0)


# ---------------------------------- Main -------------------------------------- #

if __name__ == "__main__":
    # Module config: in_channels=4, out_channels=8, kernel_size=3, stride=1, groups=2
    B, Cin, H, W = 2, 4, 16, 16
    Cout, K, groups = 8, 3, 2

    key = jax.random.PRNGKey(0)
    k_x, k_w, k_g, k_b = jax.random.split(key, 4)

    x = jax.random.normal(k_x, (B, Cin, H, W), dtype=jnp.float32)
    # Conv2d weight shape: (out_channels, in_channels // groups, K, K), no bias.
    weight = 0.1 * jax.random.normal(k_w, (Cout, Cin // groups, K, K),
                                     dtype=jnp.float32)
    # BatchNorm2d affine params.
    gamma = 1.0 + 0.1 * jax.random.normal(k_g, (Cout,), dtype=jnp.float32)
    beta = 0.1 * jax.random.normal(k_b, (Cout,), dtype=jnp.float32)

    out = resnext_conv_layer(x, weight, gamma, beta, groups=groups)
    out = jax.block_until_ready(out)

    assert out.shape == (B, Cout, H, W), out.shape

    # Structural exactness check: reference whose conv uses the SAME bf16-rounded
    # operands (f32 accumulation) -> only accumulation-order differences remain.
    ref_bf16 = _reference(x, weight, gamma, beta, groups=groups,
                          conv_dtype=jnp.bfloat16)
    assert jnp.allclose(out, ref_bf16, atol=1e-4, rtol=1e-4), (
        float(jnp.max(jnp.abs(out - ref_bf16))))

    # Sanity check against the full-f32 reference (bounded by bf16 operand rounding).
    ref_f32 = _reference(x, weight, gamma, beta, groups=groups)
    assert jnp.allclose(out, ref_f32, atol=5e-2, rtol=5e-2), (
        float(jnp.max(jnp.abs(out - ref_f32))))

    print("KERNEL_OK")
</pallas_src>

<mosaic_0001>
module attributes {stable_mosaic.version = 11 : i64} {
  func.func @_fused_conv_bn_relu_kernel(%arg0: i32, %arg1: memref<2x4x384xbf16, #tpu.memory_space<vmem>>, %arg2: memref<9x8x4xbf16, #tpu.memory_space<vmem>>, %arg3: memref<2x8x1xf32, #tpu.memory_space<vmem>>, %arg4: memref<2x8x256xf32, #tpu.memory_space<vmem>>) attributes {dimension_semantics = [#tpu.dimension_semantics<arbitrary>], iteration_bounds = array<i64: 1>, scalar_prefetch = 0 : i64, scratch_operands = 0 : i64, tpu.core_type = #tpu.core_type<tc>, window_params = [{pipeline_mode = #tpu.pipeline_mode<synchronous>, transform_indices = @transform_0, window_bounds = array<i64: 2, 4, 384>}, {pipeline_mode = #tpu.pipeline_mode<synchronous>, transform_indices = @transform_1, window_bounds = array<i64: 9, 8, 4>}, {pipeline_mode = #tpu.pipeline_mode<synchronous>, transform_indices = @transform_2, window_bounds = array<i64: 2, 8, 1>}, {pipeline_mode = #tpu.pipeline_mode<synchronous>, transform_indices = @transform_3, window_bounds = array<i64: 2, 8, 256>}]} {
    %0 = tpu.iota {dimensions = array<i32: 1>} : vector<1x256xi32>
    %c16_i32 = arith.constant 16 : i32
    %c0_i32 = arith.constant 0 : i32
    %1 = arith.cmpi eq, %c16_i32, %c0_i32 : i32
    %c1_i32 = arith.constant 1 : i32
    %2 = arith.select %1, %c1_i32, %c16_i32 : i32
    %3 = vector.broadcast %2 : i32 to vector<1x256xi32>
    %4 = arith.remsi %0, %3 : vector<1x256xi32>
    %c0_i32_0 = arith.constant 0 : i32
    %5 = vector.broadcast %c0_i32_0 : i32 to vector<1x256xi32>
    %6 = arith.cmpi ne, %4, %5 : vector<1x256xi32>
    %c0_i32_1 = arith.constant 0 : i32
    %7 = vector.broadcast %c0_i32_1 : i32 to vector<1x256xi32>
    %8 = arith.cmpi slt, %4, %7 : vector<1x256xi32>
    %c0_i32_2 = arith.constant 0 : i32
    %9 = arith.cmpi slt, %2, %c0_i32_2 : i32
    %10 = vector.broadcast %9 : i1 to vector<1x256xi1>
    %11 = vector.broadcast %10 : vector<1x256xi1> to vector<1x256xi1>
    %12 = arith.xori %8, %11 : vector<1x256xi1>
    %13 = arith.andi %12, %6 : vector<1x256xi1>
    %14 = vector.broadcast %2 : i32 to vector<1x256xi32>
    %15 = arith.addi %4, %14 : vector<1x256xi32>
    %16 = arith.select %13, %15, %4 : vector<1x256xi1>, vector<1x256xi32>
    %c1_i32_3 = arith.constant 1 : i32
    %17 = vector.broadcast %c1_i32_3 : i32 to vector<1x256xi32>
    %18 = arith.cmpi sge, %16, %17 : vector<1x256xi32>
    %19 = arith.extui %18 : vector<1x256xi1> to vector<1x256xi32>
    %20 = arith.sitofp %19 : vector<1x256xi32> to vector<1x256xf32>
    %21 = arith.truncf %20 : vector<1x256xf32> to vector<1x256xbf16>
    %c15_i32 = arith.constant 15 : i32
    %22 = vector.broadcast %c15_i32 : i32 to vector<1x256xi32>
    %23 = arith.cmpi slt, %16, %22 : vector<1x256xi32>
    %24 = arith.extui %23 : vector<1x256xi1> to vector<1x256xi32>
    %25 = arith.sitofp %24 : vector<1x256xi32> to vector<1x256xf32>
    %26 = arith.truncf %25 : vector<1x256xf32> to vector<1x256xbf16>
    %c0 = arith.constant 0 : index
    %c0_4 = arith.constant 0 : index
    %c0_5 = arith.constant 0 : index
    %27 = vector.load %arg2[%c0, %c0_4, %c0_5] : memref<9x8x4xbf16, #tpu.memory_space<vmem>>, vector<9x8x4xbf16>
    %c0_6 = arith.constant 0 : index
    %c0_7 = arith.constant 0 : index
    %c0_8 = arith.constant 0 : index
    %28 = vector.load %arg1[%c0_6, %c0_7, %c0_8] : memref<2x4x384xbf16, #tpu.memory_space<vmem>>, vector<1x4x384xbf16>
    %29 = vector.shape_cast %28 : vector<1x4x384xbf16> to vector<4x384xbf16>
    %cst = arith.constant 0.000000e+00 : f32
    %30 = vector.broadcast %cst : f32 to vector<8x256xf32>
    %31 = vector.extract_strided_slice %29 {offsets = [0, 0], sizes = [4, 256], strides = [1, 1]} : vector<4x384xbf16> to vector<4x256xbf16>
    %32 = vector.broadcast %21 : vector<1x256xbf16> to vector<4x256xbf16>
    %33 = arith.mulf %31, %32 : vector<4x256xbf16>
    %34 = vector.extract_strided_slice %27 {offsets = [0, 0, 0], sizes = [1, 8, 4], strides = [1, 1, 1]} : vector<9x8x4xbf16> to vector<1x8x4xbf16>
    %35 = vector.shape_cast %34 : vector<1x8x4xbf16> to vector<8x4xbf16>
    %cst_9 = arith.constant dense<0.000000e+00> : vector<8x256xf32>
    %36 = tpu.matmul %35, %33, %cst_9 {dimension_numbers = #tpu.dot_dimension_numbers<[1], [0], [0], [1], [0, 0, 1, 1], [], []>} : vector<8x4xbf16>, vector<4x256xbf16>, vector<8x256xf32> -> vector<8x256xf32>
    %37 = arith.addf %30, %36 : vector<8x256xf32>
    %38 = vector.extract_strided_slice %29 {offsets = [0, 1], sizes = [4, 256], strides = [1, 1]} : vector<4x384xbf16> to vector<4x256xbf16>
    %39 = vector.extract_strided_slice %27 {offsets = [1, 0, 0], sizes = [1, 8, 4], strides = [1, 1, 1]} : vector<9x8x4xbf16> to vector<1x8x4xbf16>
    %40 = vector.shape_cast %39 : vector<1x8x4xbf16> to vector<8x4xbf16>
    %cst_10 = arith.constant dense<0.000000e+00> : vector<8x256xf32>
    %41 = tpu.matmul %40, %38, %cst_10 {dimension_numbers = #tpu.dot_dimension_numbers<[1], [0], [0], [1], [0, 0, 1, 1], [], []>} : vector<8x4xbf16>, vector<4x256xbf16>, vector<8x256xf32> -> vector<8x256xf32>
    %42 = arith.addf %37, %41 : vector<8x256xf32>
    %43 = vector.extract_strided_slice %29 {offsets = [0, 2], sizes = [4, 256], strides = [1, 1]} : vector<4x384xbf16> to vector<4x256xbf16>
    %44 = vector.broadcast %26 : vector<1x256xbf16> to vector<4x256xbf16>
    %45 = arith.mulf %43, %44 : vector<4x256xbf16>
    %46 = vector.extract_strided_slice %27 {offsets = [2, 0, 0], sizes = [1, 8, 4], strides = [1, 1, 1]} : vector<9x8x4xbf16> to vector<1x8x4xbf16>
    %47 = vector.shape_cast %46 : vector<1x8x4xbf16> to vector<8x4xbf16>
    %cst_11 = arith.constant dense<0.000000e+00> : vector<8x256xf32>
    %48 = tpu.matmul %47, %45, %cst_11 {dimension_numbers = #tpu.dot_dimension_numbers<[1], [0], [0], [1], [0, 0, 1, 1], [], []>} : vector<8x4xbf16>, vector<4x256xbf16>, vector<8x256xf32> -> vector<8x256xf32>
    %49 = arith.addf %42, %48 : vector<8x256xf32>
    %50 = vector.extract_strided_slice %29 {offsets = [0, 16], sizes = [4, 256], strides = [1, 1]} : vector<4x384xbf16> to vector<4x256xbf16>
    %51 = vector.broadcast %21 : vector<1x256xbf16> to vector<4x256xbf16>
    %52 = arith.mulf %50, %51 : vector<4x256xbf16>
    %53 = vector.extract_strided_slice %27 {offsets = [3, 0, 0], sizes = [1, 8, 4], strides = [1, 1, 1]} : vector<9x8x4xbf16> to vector<1x8x4xbf16>
    %54 = vector.shape_cast %53 : vector<1x8x4xbf16> to vector<8x4xbf16>
    %cst_12 = arith.constant dense<0.000000e+00> : vector<8x256xf32>
    %55 = tpu.matmul %54, %52, %cst_12 {dimension_numbers = #tpu.dot_dimension_numbers<[1], [0], [0], [1], [0, 0, 1, 1], [], []>} : vector<8x4xbf16>, vector<4x256xbf16>, vector<8x256xf32> -> vector<8x256xf32>
    %56 = arith.addf %49, %55 : vector<8x256xf32>
    %57 = vector.extract_strided_slice %29 {offsets = [0, 17], sizes = [4, 256], strides = [1, 1]} : vector<4x384xbf16> to vector<4x256xbf16>
    %58 = vector.extract_strided_slice %27 {offsets = [4, 0, 0], sizes = [1, 8, 4], strides = [1, 1, 1]} : vector<9x8x4xbf16> to vector<1x8x4xbf16>
    %59 = vector.shape_cast %58 : vector<1x8x4xbf16> to vector<8x4xbf16>
    %cst_13 = arith.constant dense<0.000000e+00> : vector<8x256xf32>
    %60 = tpu.matmul %59, %57, %cst_13 {dimension_numbers = #tpu.dot_dimension_numbers<[1], [0], [0], [1], [0, 0, 1, 1], [], []>} : vector<8x4xbf16>, vector<4x256xbf16>, vector<8x256xf32> -> vector<8x256xf32>
    %61 = arith.addf %56, %60 : vector<8x256xf32>
    %62 = vector.extract_strided_slice %29 {offsets = [0, 18], sizes = [4, 256], strides = [1, 1]} : vector<4x384xbf16> to vector<4x256xbf16>
    %63 = vector.broadcast %26 : vector<1x256xbf16> to vector<4x256xbf16>
    %64 = arith.mulf %62, %63 : vector<4x256xbf16>
    %65 = vector.extract_strided_slice %27 {offsets = [5, 0, 0], sizes = [1, 8, 4], strides = [1, 1, 1]} : vector<9x8x4xbf16> to vector<1x8x4xbf16>
    %66 = vector.shape_cast %65 : vector<1x8x4xbf16> to vector<8x4xbf16>
    %cst_14 = arith.constant dense<0.000000e+00> : vector<8x256xf32>
    %67 = tpu.matmul %66, %64, %cst_14 {dimension_numbers = #tpu.dot_dimension_numbers<[1], [0], [0], [1], [0, 0, 1, 1], [], []>} : vector<8x4xbf16>, vector<4x256xbf16>, vector<8x256xf32> -> vector<8x256xf32>
    %68 = arith.addf %61, %67 : vector<8x256xf32>
    %69 = vector.extract_strided_slice %29 {offsets = [0, 32], sizes = [4, 256], strides = [1, 1]} : vector<4x384xbf16> to vector<4x256xbf16>
    %70 = vector.broadcast %21 : vector<1x256xbf16> to vector<4x256xbf16>
    %71 = arith.mulf %69, %70 : vector<4x256xbf16>
    %72 = vector.extract_strided_slice %27 {offsets = [6, 0, 0], sizes = [1, 8, 4], strides = [1, 1, 1]} : vector<9x8x4xbf16> to vector<1x8x4xbf16>
    %73 = vector.shape_cast %72 : vector<1x8x4xbf16> to vector<8x4xbf16>
    %cst_15 = arith.constant dense<0.000000e+00> : vector<8x256xf32>
    %74 = tpu.matmul %73, %71, %cst_15 {dimension_numbers = #tpu.dot_dimension_numbers<[1], [0], [0], [1], [0, 0, 1, 1], [], []>} : vector<8x4xbf16>, vector<4x256xbf16>, vector<8x256xf32> -> vector<8x256xf32>
    %75 = arith.addf %68, %74 : vector<8x256xf32>
    %76 = vector.extract_strided_slice %29 {offsets = [0, 33], sizes = [4, 256], strides = [1, 1]} : vector<4x384xbf16> to vector<4x256xbf16>
    %77 = vector.extract_strided_slice %27 {offsets = [7, 0, 0], sizes = [1, 8, 4], strides = [1, 1, 1]} : vector<9x8x4xbf16> to vector<1x8x4xbf16>
    %78 = vector.shape_cast %77 : vector<1x8x4xbf16> to vector<8x4xbf16>
    %cst_16 = arith.constant dense<0.000000e+00> : vector<8x256xf32>
    %79 = tpu.matmul %78, %76, %cst_16 {dimension_numbers = #tpu.dot_dimension_numbers<[1], [0], [0], [1], [0, 0, 1, 1], [], []>} : vector<8x4xbf16>, vector<4x256xbf16>, vector<8x256xf32> -> vector<8x256xf32>
    %80 = arith.addf %75, %79 : vector<8x256xf32>
    %81 = vector.extract_strided_slice %29 {offsets = [0, 34], sizes = [4, 256], strides = [1, 1]} : vector<4x384xbf16> to vector<4x256xbf16>
    %82 = vector.broadcast %26 : vector<1x256xbf16> to vector<4x256xbf16>
    %83 = arith.mulf %81, %82 : vector<4x256xbf16>
    %84 = vector.extract_strided_slice %27 {offsets = [8, 0, 0], sizes = [1, 8, 4], strides = [1, 1, 1]} : vector<9x8x4xbf16> to vector<1x8x4xbf16>
    %85 = vector.shape_cast %84 : vector<1x8x4xbf16> to vector<8x4xbf16>
    %cst_17 = arith.constant dense<0.000000e+00> : vector<8x256xf32>
    %86 = tpu.matmul %85, %83, %cst_17 {dimension_numbers = #tpu.dot_dimension_numbers<[1], [0], [0], [1], [0, 0, 1, 1], [], []>} : vector<8x4xbf16>, vector<4x256xbf16>, vector<8x256xf32> -> vector<8x256xf32>
    %87 = arith.addf %80, %86 : vector<8x256xf32>
    %c1 = arith.constant 1 : index
    %c0_18 = arith.constant 0 : index
    %c0_19 = arith.constant 0 : index
    %88 = vector.load %arg1[%c1, %c0_18, %c0_19] : memref<2x4x384xbf16, #tpu.memory_space<vmem>>, vector<1x4x384xbf16>
    %89 = vector.shape_cast %88 : vector<1x4x384xbf16> to vector<4x384xbf16>
    %cst_20 = arith.constant 0.000000e+00 : f32
    %90 = vector.broadcast %cst_20 : f32 to vector<8x256xf32>
    %91 = vector.extract_strided_slice %89 {offsets = [0, 0], sizes = [4, 256], strides = [1, 1]} : vector<4x384xbf16> to vector<4x256xbf16>
    %92 = vector.broadcast %21 : vector<1x256xbf16> to vector<4x256xbf16>
    %93 = arith.mulf %91, %92 : vector<4x256xbf16>
    %94 = vector.extract_strided_slice %27 {offsets = [0, 0, 0], sizes = [1, 8, 4], strides = [1, 1, 1]} : vector<9x8x4xbf16> to vector<1x8x4xbf16>
    %95 = vector.shape_cast %94 : vector<1x8x4xbf16> to vector<8x4xbf16>
    %cst_21 = arith.constant dense<0.000000e+00> : vector<8x256xf32>
    %96 = tpu.matmul %95, %93, %cst_21 {dimension_numbers = #tpu.dot_dimension_numbers<[1], [0], [0], [1], [0, 0, 1, 1], [], []>} : vector<8x4xbf16>, vector<4x256xbf16>, vector<8x256xf32> -> vector<8x256xf32>
    %97 = arith.addf %90, %96 : vector<8x256xf32>
    %98 = vector.extract_strided_slice %89 {offsets = [0, 1], sizes = [4, 256], strides = [1, 1]} : vector<4x384xbf16> to vector<4x256xbf16>
    %99 = vector.extract_strided_slice %27 {offsets = [1, 0, 0], sizes = [1, 8, 4], strides = [1, 1, 1]} : vector<9x8x4xbf16> to vector<1x8x4xbf16>
    %100 = vector.shape_cast %99 : vector<1x8x4xbf16> to vector<8x4xbf16>
    %cst_22 = arith.constant dense<0.000000e+00> : vector<8x256xf32>
    %101 = tpu.matmul %100, %98, %cst_22 {dimension_numbers = #tpu.dot_dimension_numbers<[1], [0], [0], [1], [0, 0, 1, 1], [], []>} : vector<8x4xbf16>, vector<4x256xbf16>, vector<8x256xf32> -> vector<8x256xf32>
    %102 = arith.addf %97, %101 : vector<8x256xf32>
    %103 = vector.extract_strided_slice %89 {offsets = [0, 2], sizes = [4, 256], strides = [1, 1]} : vector<4x384xbf16> to vector<4x256xbf16>
    %104 = vector.broadcast %26 : vector<1x256xbf16> to vector<4x256xbf16>
    %105 = arith.mulf %103, %104 : vector<4x256xbf16>
    %106 = vector.extract_strided_slice %27 {offsets = [2, 0, 0], sizes = [1, 8, 4], strides = [1, 1, 1]} : vector<9x8x4xbf16> to vector<1x8x4xbf16>
    %107 = vector.shape_cast %106 : vector<1x8x4xbf16> to vector<8x4xbf16>
    %cst_23 = arith.constant dense<0.000000e+00> : vector<8x256xf32>
    %108 = tpu.matmul %107, %105, %cst_23 {dimension_numbers = #tpu.dot_dimension_numbers<[1], [0], [0], [1], [0, 0, 1, 1], [], []>} : vector<8x4xbf16>, vector<4x256xbf16>, vector<8x256xf32> -> vector<8x256xf32>
    %109 = arith.addf %102, %108 : vector<8x256xf32>
    %110 = vector.extract_strided_slice %89 {offsets = [0, 16], sizes = [4, 256], strides = [1, 1]} : vector<4x384xbf16> to vector<4x256xbf16>
    %111 = vector.broadcast %21 : vector<1x256xbf16> to vector<4x256xbf16>
    %112 = arith.mulf %110, %111 : vector<4x256xbf16>
    %113 = vector.extract_strided_slice %27 {offsets = [3, 0, 0], sizes = [1, 8, 4], strides = [1, 1, 1]} : vector<9x8x4xbf16> to vector<1x8x4xbf16>
    %114 = vector.shape_cast %113 : vector<1x8x4xbf16> to vector<8x4xbf16>
    %cst_24 = arith.constant dense<0.000000e+00> : vector<8x256xf32>
    %115 = tpu.matmul %114, %112, %cst_24 {dimension_numbers = #tpu.dot_dimension_numbers<[1], [0], [0], [1], [0, 0, 1, 1], [], []>} : vector<8x4xbf16>, vector<4x256xbf16>, vector<8x256xf32> -> vector<8x256xf32>
    %116 = arith.addf %109, %115 : vector<8x256xf32>
    %117 = vector.extract_strided_slice %89 {offsets = [0, 17], sizes = [4, 256], strides = [1, 1]} : vector<4x384xbf16> to vector<4x256xbf16>
    %118 = vector.extract_strided_slice %27 {offsets = [4, 0, 0], sizes = [1, 8, 4], strides = [1, 1, 1]} : vector<9x8x4xbf16> to vector<1x8x4xbf16>
    %119 = vector.shape_cast %118 : vector<1x8x4xbf16> to vector<8x4xbf16>
    %cst_25 = arith.constant dense<0.000000e+00> : vector<8x256xf32>
    %120 = tpu.matmul %119, %117, %cst_25 {dimension_numbers = #tpu.dot_dimension_numbers<[1], [0], [0], [1], [0, 0, 1, 1], [], []>} : vector<8x4xbf16>, vector<4x256xbf16>, vector<8x256xf32> -> vector<8x256xf32>
    %121 = arith.addf %116, %120 : vector<8x256xf32>
    %122 = vector.extract_strided_slice %89 {offsets = [0, 18], sizes = [4, 256], strides = [1, 1]} : vector<4x384xbf16> to vector<4x256xbf16>
    %123 = vector.broadcast %26 : vector<1x256xbf16> to vector<4x256xbf16>
    %124 = arith.mulf %122, %123 : vector<4x256xbf16>
    %125 = vector.extract_strided_slice %27 {offsets = [5, 0, 0], sizes = [1, 8, 4], strides = [1, 1, 1]} : vector<9x8x4xbf16> to vector<1x8x4xbf16>
    %126 = vector.shape_cast %125 : vector<1x8x4xbf16> to vector<8x4xbf16>
    %cst_26 = arith.constant dense<0.000000e+00> : vector<8x256xf32>
    %127 = tpu.matmul %126, %124, %cst_26 {dimension_numbers = #tpu.dot_dimension_numbers<[1], [0], [0], [1], [0, 0, 1, 1], [], []>} : vector<8x4xbf16>, vector<4x256xbf16>, vector<8x256xf32> -> vector<8x256xf32>
    %128 = arith.addf %121, %127 : vector<8x256xf32>
    %129 = vector.extract_strided_slice %89 {offsets = [0, 32], sizes = [4, 256], strides = [1, 1]} : vector<4x384xbf16> to vector<4x256xbf16>
    %130 = vector.broadcast %21 : vector<1x256xbf16> to vector<4x256xbf16>
    %131 = arith.mulf %129, %130 : vector<4x256xbf16>
    %132 = vector.extract_strided_slice %27 {offsets = [6, 0, 0], sizes = [1, 8, 4], strides = [1, 1, 1]} : vector<9x8x4xbf16> to vector<1x8x4xbf16>
    %133 = vector.shape_cast %132 : vector<1x8x4xbf16> to vector<8x4xbf16>
    %cst_27 = arith.constant dense<0.000000e+00> : vector<8x256xf32>
    %134 = tpu.matmul %133, %131, %cst_27 {dimension_numbers = #tpu.dot_dimension_numbers<[1], [0], [0], [1], [0, 0, 1, 1], [], []>} : vector<8x4xbf16>, vector<4x256xbf16>, vector<8x256xf32> -> vector<8x256xf32>
    %135 = arith.addf %128, %134 : vector<8x256xf32>
    %136 = vector.extract_strided_slice %89 {offsets = [0, 33], sizes = [4, 256], strides = [1, 1]} : vector<4x384xbf16> to vector<4x256xbf16>
    %137 = vector.extract_strided_slice %27 {offsets = [7, 0, 0], sizes = [1, 8, 4], strides = [1, 1, 1]} : vector<9x8x4xbf16> to vector<1x8x4xbf16>
    %138 = vector.shape_cast %137 : vector<1x8x4xbf16> to vector<8x4xbf16>
    %cst_28 = arith.constant dense<0.000000e+00> : vector<8x256xf32>
    %139 = tpu.matmul %138, %136, %cst_28 {dimension_numbers = #tpu.dot_dimension_numbers<[1], [0], [0], [1], [0, 0, 1, 1], [], []>} : vector<8x4xbf16>, vector<4x256xbf16>, vector<8x256xf32> -> vector<8x256xf32>
    %140 = arith.addf %135, %139 : vector<8x256xf32>
    %141 = vector.extract_strided_slice %89 {offsets = [0, 34], sizes = [4, 256], strides = [1, 1]} : vector<4x384xbf16> to vector<4x256xbf16>
    %142 = vector.broadcast %26 : vector<1x256xbf16> to vector<4x256xbf16>
    %143 = arith.mulf %141, %142 : vector<4x256xbf16>
    %144 = vector.extract_strided_slice %27 {offsets = [8, 0, 0], sizes = [1, 8, 4], strides = [1, 1, 1]} : vector<9x8x4xbf16> to vector<1x8x4xbf16>
    %145 = vector.shape_cast %144 : vector<1x8x4xbf16> to vector<8x4xbf16>
    %cst_29 = arith.constant dense<0.000000e+00> : vector<8x256xf32>
    %146 = tpu.matmul %145, %143, %cst_29 {dimension_numbers = #tpu.dot_dimension_numbers<[1], [0], [0], [1], [0, 0, 1, 1], [], []>} : vector<8x4xbf16>, vector<4x256xbf16>, vector<8x256xf32> -> vector<8x256xf32>
    %147 = arith.addf %140, %146 : vector<8x256xf32>
    %cst_30 = arith.constant 0.000000e+00 : f32
    %148 = vector.broadcast %cst_30 : f32 to vector<8x1xf32>
    %cst_31 = arith.constant dense<0.000000e+00> : vector<8xf32>
    %149 = vector.multi_reduction <add>, %87, %cst_31 [1] : vector<8x256xf32> to vector<8xf32>
    %150 = vector.shape_cast %149 : vector<8xf32> to vector<8x1xf32>
    %151 = arith.addf %148, %150 : vector<8x1xf32>
    %cst_32 = arith.constant dense<0.000000e+00> : vector<8xf32>
    %152 = vector.multi_reduction <add>, %147, %cst_32 [1] : vector<8x256xf32> to vector<8xf32>
    %153 = vector.shape_cast %152 : vector<8xf32> to vector<8x1xf32>
    %154 = arith.addf %151, %153 : vector<8x1xf32>
    %cst_33 = arith.constant 5.120000e+02 : f32
    %155 = vector.broadcast %cst_33 : f32 to vector<8x1xf32>
    %156 = arith.divf %154, %155 : vector<8x1xf32>
    %cst_34 = arith.constant 0.000000e+00 : f32
    %157 = vector.broadcast %cst_34 : f32 to vector<8x1xf32>
    %158 = vector.broadcast %156 : vector<8x1xf32> to vector<8x256xf32>
    %159 = arith.subf %87, %158 : vector<8x256xf32>
    %160 = arith.mulf %159, %159 : vector<8x256xf32>
    %cst_35 = arith.constant dense<0.000000e+00> : vector<8xf32>
    %161 = vector.multi_reduction <add>, %160, %cst_35 [1] : vector<8x256xf32> to vector<8xf32>
    %162 = vector.shape_cast %161 : vector<8xf32> to vector<8x1xf32>
    %163 = arith.addf %157, %162 : vector<8x1xf32>
    %164 = vector.broadcast %156 : vector<8x1xf32> to vector<8x256xf32>
    %165 = arith.subf %147, %164 : vector<8x256xf32>
    %166 = arith.mulf %165, %165 : vector<8x256xf32>
    %cst_36 = arith.constant dense<0.000000e+00> : vector<8xf32>
    %167 = vector.multi_reduction <add>, %166, %cst_36 [1] : vector<8x256xf32> to vector<8xf32>
    %168 = vector.shape_cast %167 : vector<8xf32> to vector<8x1xf32>
    %169 = arith.addf %163, %168 : vector<8x1xf32>
    %cst_37 = arith.constant 5.120000e+02 : f32
    %170 = vector.broadcast %cst_37 : f32 to vector<8x1xf32>
    %171 = arith.divf %169, %170 : vector<8x1xf32>
    %c0_38 = arith.constant 0 : index
    %c0_39 = arith.constant 0 : index
    %c0_40 = arith.constant 0 : index
    %172 = vector.load %arg3[%c0_38, %c0_39, %c0_40] : memref<2x8x1xf32, #tpu.memory_space<vmem>>, vector<1x8x1xf32>
    %173 = vector.shape_cast %172 : vector<1x8x1xf32> to vector<8x1xf32>
    %cst_41 = arith.constant 9.99999974E-6 : f32
    %174 = vector.broadcast %cst_41 : f32 to vector<8x1xf32>
    %175 = arith.addf %171, %174 : vector<8x1xf32>
    %176 = math.rsqrt %175 : vector<8x1xf32>
    %177 = arith.mulf %173, %176 : vector<8x1xf32>
    %c1_42 = arith.constant 1 : index
    %c0_43 = arith.constant 0 : index
    %c0_44 = arith.constant 0 : index
    %178 = vector.load %arg3[%c1_42, %c0_43, %c0_44] : memref<2x8x1xf32, #tpu.memory_space<vmem>>, vector<1x8x1xf32>
    %179 = vector.shape_cast %178 : vector<1x8x1xf32> to vector<8x1xf32>
    %180 = vector.broadcast %156 : vector<8x1xf32> to vector<8x256xf32>
    %181 = arith.subf %87, %180 : vector<8x256xf32>
    %182 = vector.broadcast %177 : vector<8x1xf32> to vector<8x256xf32>
    %183 = arith.mulf %181, %182 : vector<8x256xf32>
    %184 = vector.broadcast %179 : vector<8x1xf32> to vector<8x256xf32>
    %185 = arith.addf %183, %184 : vector<8x256xf32>
    %cst_45 = arith.constant 0.000000e+00 : f32
    %186 = vector.broadcast %cst_45 : f32 to vector<8x256xf32>
    %187 = arith.maximumf %185, %186 : vector<8x256xf32>
    %c0_46 = arith.constant 0 : index
    %c0_47 = arith.constant 0 : index
    %c0_48 = arith.constant 0 : index
    %188 = vector.load %arg4[%c0_46, %c0_47, %c0_48] : memref<2x8x256xf32, #tpu.memory_space<vmem>>, vector<1x8x256xf32>
    %189 = vector.shape_cast %188 : vector<1x8x256xf32> to vector<8x256xf32>
    %190 = vector.shape_cast %187 : vector<8x256xf32> to vector<1x8x256xf32>
    tpu.vector_store %arg4[%c0_46, %c0_47, %c0_48], %190 {strides = array<i32>} : memref<2x8x256xf32, #tpu.memory_space<vmem>>, vector<1x8x256xf32>,
    %191 = vector.broadcast %156 : vector<8x1xf32> to vector<8x256xf32>
    %192 = arith.subf %147, %191 : vector<8x256xf32>
    %193 = vector.broadcast %177 : vector<8x1xf32> to vector<8x256xf32>
    %194 = arith.mulf %192, %193 : vector<8x256xf32>
    %195 = vector.broadcast %179 : vector<8x1xf32> to vector<8x256xf32>
    %196 = arith.addf %194, %195 : vector<8x256xf32>
    %cst_49 = arith.constant 0.000000e+00 : f32
    %197 = vector.broadcast %cst_49 : f32 to vector<8x256xf32>
    %198 = arith.maximumf %196, %197 : vector<8x256xf32>
    %c1_50 = arith.constant 1 : index
    %c0_51 = arith.constant 0 : index
    %c0_52 = arith.constant 0 : index
    %199 = vector.load %arg4[%c1_50, %c0_51, %c0_52] : memref<2x8x256xf32, #tpu.memory_space<vmem>>, vector<1x8x256xf32>
    %200 = vector.shape_cast %199 : vector<1x8x256xf32> to vector<8x256xf32>
    %201 = vector.shape_cast %198 : vector<8x256xf32> to vector<1x8x256xf32>
    tpu.vector_store %arg4[%c1_50, %c0_51, %c0_52], %201 {strides = array<i32>} : memref<2x8x256xf32, #tpu.memory_space<vmem>>, vector<1x8x256xf32>,
    return
  }
  func.func @transform_0(%arg0: i32) -> (i32, i32, i32) {
    %c0_i32 = arith.constant 0 : i32
    %c0_i32_0 = arith.constant 0 : i32
    %c0_i32_1 = arith.constant 0 : i32
    %c0_i32_2 = arith.constant 0 : i32
    return %c0_i32, %c0_i32_0, %c0_i32_1 : i32, i32, i32
  }
  func.func @transform_1(%arg0: i32) -> (i32, i32, i32) {
    %c0_i32 = arith.constant 0 : i32
    %c0_i32_0 = arith.constant 0 : i32
    %c0_i32_1 = arith.constant 0 : i32
    %c0_i32_2 = arith.constant 0 : i32
    return %c0_i32, %c0_i32_0, %c0_i32_1 : i32, i32, i32
  }
  func.func @transform_2(%arg0: i32) -> (i32, i32, i32) {
    %c0_i32 = arith.constant 0 : i32
    %c0_i32_0 = arith.constant 0 : i32
    %c0_i32_1 = arith.constant 0 : i32
    %c0_i32_2 = arith.constant 0 : i32
    return %c0_i32, %c0_i32_0, %c0_i32_1 : i32, i32, i32
  }
  func.func @transform_3(%arg0: i32) -> (i32, i32, i32) {
    %c0_i32 = arith.constant 0 : i32
    %c0_i32_0 = arith.constant 0 : i32
    %c0_i32_1 = arith.constant 0 : i32
    %c0_i32_2 = arith.constant 0 : i32
    return %c0_i32, %c0_i32_0, %c0_i32_1 : i32, i32, i32
  }
}

</mosaic_0001>

<bundles_post_ra>
// kernel: tpu_custom_call.1
= control target key start
LH: loop header
LB: loop body
LE: loop exit
PB: predicated region body
PF: predicated region fallthrough
CT: control target
= control target key end

     0   :  { %v16_v0 = vlaneseq  ;;  %s1741_s0 = inlined_call_operand.vmem [shape: bf16[2,4,384], index: 0, kind: input, shape index: {}]   ;;  %s1742_s1 = inlined_call_operand.vmem [shape: bf16[9,8,4], index: 1, kind: input, shape index: {}]   ;;  %s1743_s2 = inlined_call_operand.vmem [shape: f32[2,8,1], index: 2, kind: input, shape index: {}]   ;;  %s1744_s3 = inlined_call_operand.hbm [shape: f32[2,8,256], index: 3, kind: output, shape index: {}]  }
   0x2   :  { %v17_v1 = vand.u32 127, %v16_v0 }
   0x3   :  { %8 = vsyncpa [#allocation3], 0  ;;  %v1369_v4 = vld [vmem:[%s1741_s0] sm:$0x3f]  ;;  %vm73_vm3 = vcmask 1043456   ;;  %v1328_v7 = vmov 0.0  }
   0x4   :  { %v18_v2 = vadd.s32 128, %v17_v1  ;;  %v23_v3 = vand.u32 15, %v17_v1  ;;  %v1372_v6 = vunpack.c.l.bf16 %v1369_v4  ;;  %s1329_s14 = smov 2   ;;  %s1330_s15 = smov 18   ;;  %v1390_v22 = vunpack.c.h.bf16 %v1369_v4 }
   0x5   :  { %s1331_s16 = smov 34   ;;  %s1332_s17 = smov 16   ;;  %vm184_vm5 = vcmask 15360   ;;  %vm256_vm6 = vcmask 130048   ;;  %vm381_vm7 = vcmask 146432   ;;  %vm453_vm8 = vcmask 261120  }
   0x6   :  { %v30_v5 = vand.u32 15, %v18_v2  ;;  %vm50_vm0 = vcmp.lt.s32.totalorder %v23_v3, 15  ;;  %vm43_vm1 = vcmp.ge.s32.totalorder %v23_v3, 1  ;;  %s1333_s18 = smov 32   ;;  %s1334_s19 = smov 127   ;;  %vm578_vm9 = vcmask 277504  }
   0x7   :  { %v1238_v8 = vsel %vm50_vm0, 1.0, %v1328_v7  ;;  %v1236_v10 = vsel %vm43_vm1, 1.0, %v1328_v7  ;;  %s1335_s20 = smov 112   ;;  %s1336_s21 = smov 126   ;;  %vm106_vm10 = vcmask 1041408   ;;  %vm102_vm11 = vcmask 31744  }
   0x8   :  { %vm51_vm2 = vcmp.lt.s32.totalorder %v30_v5, 15  ;;  %vm44_vm4 = vcmp.ge.s32.totalorder %v30_v5, 1  ;;  %s1337_s22 = smov 110   ;;  %s1338_s23 = smov 111   ;;  %vm99_vm12 = vcmask 1039360   ;;  %vm285_vm13 = vcmask 916480  }
   0x9   :  { %v1239_v9 = vsel %vm51_vm2, 1.0, %v1328_v7  ;;  %v1237_v11 = vsel %vm44_vm4, 1.0, %v1328_v7  ;;  %s1339_s26 = smov 95   ;;  %s1341_s27 = smov 94   ;;  %vm213_vm14 = vcmask 1031168   ;;  %vm410_vm15 = vcmask 900096  }
   0xa   :  { %v179_v12 = vrot.slane %v1239_v9, 4  ;;  %v72_v13 = vrot.slane %v1237_v11, 4  ;;  %v1452_v9 = vld [vmem:[%s1741_s0 + $0x6] sm:$0x3f]  ;;  %s1340_s0 = smov 96   ;;  %vm338_vm0 = vcmask 908288  }
   0xb   :  { %vm535_vm1 = vcmask 777216   ;;  %vm482_vm2 = vcmask 785408  }
   0xc   :  { %v180_v14 = vsel %vm73_vm3, %v1238_v8, %v179_v12  ;;  %v1374_v15 = vsel %vm73_vm3, %v1236_v10, %v72_v13  ;;  %v1459_v13 = vunpack.c.l.bf16 %v1452_v9  ;;  %vm607_vm3 = vcmask 769024  }
   0xd   :  { %181 = vrot.lane.b32.xlu0 %v180_v14, %s1329_s14  ;;  %v76_v16 = vmul.f32 %v1374_v15, %v1372_v6  ;;  %378 = vrot.lane.b32.xlu1 %v180_v14, %s1330_s15 }
   0xe   :  { %575 = vrot.lane.b32.xlu2 %v180_v14, %s1331_s16  ;;  %v650_v14 = vmul.f32 %v1459_v13, %v1374_v15 }
   0xf   :  { %78 = vst [vmem:[#allocation1] ss:$2 sm:$0xff] %v76_v16 }
  0x15   :  { %253 = vrot.lane.b32.xlu0 %v1374_v15, %s1332_s17  ;;  %450 = vrot.lane.b32.xlu1 %v1374_v15, %s1333_s18  ;;  %v1473_v15 = vunpack.c.h.bf16 %v1452_v9 }
  0x16   :  { %v1381_v17 = vld.sshfl [vmem:[#allocation1] sm:$0xff pattern:$0x75316420]  ;;  %v1383_v18 = vld.sshfl [vmem:[#allocation1 + $0x8] sm:$0xff pattern:$0x75316420] }
  0x17   :  { %86 = vst [vmem:[#allocation1] ss:$4 sm:$0xff] %v1369_v4 }
  0x1e   :  { %v87_v19 = vld.sshfl [vmem:[#allocation1] sm:$0xff pattern:$0x73625140]  ;;  %v89_v20 = vld.sshfl [vmem:[#allocation1 + $0x8] sm:$0xff pattern:$0x73625140] }
  0x1f   :  { %v91_v21 = vld.sshfl [vmem:[#allocation1 + $0x10] sm:$0xff pattern:$0x73625140]  ;;  %95 = vrot.lane.b32.xlu0 %v89_v20, %s1334_s19  ;;  %93 = vrot.lane.b32.xlu2 %v87_v19, %s1334_s19 }
  0x20   :  { %97 = vrot.lane.b32.xlu1 %v91_v21, %s1334_s19 }
  0x68   :  { %v576_v0 = vpop.permute.xlu2 %575 }
  0x69   :  { %v1438_v5 = vrot.slane %v576_v0, 4 }
  0x6b   :  { %v1445_v7 = vsel %vm578_vm9, %v1438_v5, %v576_v0  ;;  %v583_v8 = vmul.f32 %v1438_v5, %v1390_v22 }
  0x7f   :  { %v182_v23 = vpop.permute.xlu0 %181  ;;  %v379_v36 = vpop.permute.xlu1 %378 }
  0x80   :  { %v1392_v24 = vrot.slane %v182_v23, 4  ;;  %v1410_v40 = vrot.slane %v379_v36, 4 }
  0x82   :  { %v1395_v25 = vsel %vm184_vm5, %v1392_v24, %v182_v23  ;;  %v189_v26 = vmul.f32 %v1392_v24, %v1390_v22  ;;  %v1417_v44 = vsel %vm381_vm7, %v1410_v40, %v379_v36  ;;  %v386_v46 = vmul.f32 %v1410_v40, %v1390_v22 }
  0x83   :  { %v188_v27 = vmul.f32 %v1395_v25, %v1372_v6  ;;  %v385_v47 = vmul.f32 %v1417_v44, %v1372_v6 }
  0x84   :  { %194 = vst [vmem:[#allocation1 + $0x10] ss:$2 sm:$0xff] %v189_v26 }
  0x85   :  { %192 = vst [vmem:[#allocation1] ss:$2 sm:$0xff] %v188_v27  ;;  %v740_v27 = vmul.f32 %v1459_v13, %v1395_v25 }
  0x87   :  { %v254_v28 = vpop.permute.xlu0 %253  ;;  %v451_v45 = vpop.permute.xlu1 %450 }
  0x88   :  { %v1401_v29 = vrot.slane %v254_v28, 4  ;;  %v1423_v48 = vrot.slane %v451_v45, 4 }
  0x8a   :  { %v1404_v30 = vsel %vm256_vm6, %v1401_v29, %v254_v28  ;;  %v261_v31 = vmul.f32 %v1401_v29, %v1390_v22  ;;  %v1429_v55 = vsel %vm453_vm8, %v1423_v48, %v451_v45  ;;  %v458_v56 = vmul.f32 %v1423_v48, %v1390_v22 }
  0x8b   :  { %v197_v32 = vld.sshfl [vmem:[#allocation1 + $0x10] sm:$0xff pattern:$0x75316420]  ;;  %v260_v33 = vmul.f32 %v1404_v30, %v1372_v6  ;;  %v457_v57 = vmul.f32 %v1429_v55, %v1372_v6  ;;  %v741_v28 = vmul.f32 %v1473_v15, %v1392_v24  ;;  %v802_v25 = vmul.f32 %v1473_v15, %v1401_v29 }
  0x8c   :  { %v195_v34 = vld.sshfl [vmem:[#allocation1] sm:$0xff pattern:$0x75316420]  ;;  %v196_v35 = vld.sshfl [vmem:[#allocation1 + $0x8] sm:$0xff pattern:$0x75316420]  ;;  %v203_v54 = vpack.c.bf16 %v197_v32, %v197_v32  ;;  %v972_v0 = vmul.f32 %v1459_v13, %v1429_v55 }
  0x8d   :  { %264 = vst [vmem:[#allocation1] ss:$2 sm:$0xff] %v260_v33  ;;  %v202_v51 = vpack.c.bf16 %v196_v35, %v196_v35  ;;  %v201_v52 = vpack.c.bf16 %v195_v34, %v195_v34  ;;  %v801_v34 = vmul.f32 %v1459_v13, %v1404_v30 }
  0x8e   :  { %266 = vst [vmem:[#allocation1 + $0x10] ss:$2 sm:$0xff] %v261_v31 }
  0x94   :  { %v267_v37 = vld.sshfl [vmem:[#allocation1] sm:$0xff pattern:$0x75316420]  ;;  %v268_v38 = vld.sshfl [vmem:[#allocation1 + $0x8] sm:$0xff pattern:$0x75316420] }
  0x95   :  { %v269_v39 = vld.sshfl [vmem:[#allocation1 + $0x10] sm:$0xff pattern:$0x75316420]  ;;  %v274_v41 = vpack.c.bf16 %v268_v38, %v268_v38  ;;  %v273_v42 = vpack.c.bf16 %v267_v37, %v267_v37 }
  0x96   :  { %325 = vst [vmem:[#allocation1] ss:$4 sm:$0xff] %v1369_v4  ;;  %v275_v43 = vpack.c.bf16 %v269_v39, %v269_v39 }
  0x97   :  { %281 = vrot.lane.b32.xlu0 %v274_v41, %s1335_s20  ;;  %279 = vrot.lane.b32.xlu2 %v273_v42, %s1335_s20 }
  0x98   :  { %283 = vrot.lane.b32.xlu1 %v275_v43, %s1335_s20 }
  0x9d   :  { %v326_v49 = vld.sshfl [vmem:[#allocation1] sm:$0xff pattern:$0x73625140]  ;;  %v328_v50 = vld.sshfl [vmem:[#allocation1 + $0x8] sm:$0xff pattern:$0x73625140] }
  0x9e   :  { %v330_v53 = vld.sshfl [vmem:[#allocation1 + $0x10] sm:$0xff pattern:$0x73625140]  ;;  %389 = vst [vmem:[#allocation1] ss:$2 sm:$0xff] %v385_v47  ;;  %v83_v47 = vpack.c.bf16 %v1381_v17, %v1381_v17 }
  0x9f   :  { %391 = vst [vmem:[#allocation1 + $0x10] ss:$2 sm:$0xff] %v386_v46  ;;  %209 = vrot.lane.b32.xlu0 %v202_v51, %s1336_s21  ;;  %207 = vrot.lane.b32.xlu2 %v201_v52, %s1336_s21  ;;  %v84_v46 = vpack.c.bf16 %v1383_v18, %v1383_v18  ;;  %v94_v51 = vpop.permute.xlu2 %93  ;;  %v98_v52 = vpop.permute.xlu1 %97 }
  0xa0   :  { %211 = vrot.lane.b32.xlu1 %v203_v54, %s1336_s21  ;;  %v1502_v54 = vld [vmem:[%s1742_s1] sm:$0xf] }
  0xa5   :  { %v393_v58 = vld.sshfl [vmem:[#allocation1 + $0x8] sm:$0xff pattern:$0x75316420]  ;;  %v392_v59 = vld.sshfl [vmem:[#allocation1] sm:$0xff pattern:$0x75316420] }
  0xa6   :  { %v394_v60 = vld.sshfl [vmem:[#allocation1 + $0x10] sm:$0xff pattern:$0x75316420]  ;;  %v399_v61 = vpack.c.bf16 %v393_v58, %v393_v58  ;;  %v398_v62 = vpack.c.bf16 %v392_v59, %v392_v59  ;;  %461 = vst [vmem:[#allocation1] ss:$2 sm:$0xff] %v457_v57 }
  0xa7   :  { %463 = vst [vmem:[#allocation1 + $0x10] ss:$2 sm:$0xff] %v458_v56  ;;  %v400_v63 = vpack.c.bf16 %v394_v60, %v394_v60  ;;  %v912_v56 = vmul.f32 %v1473_v15, %v1410_v40  ;;  %v1517_v59 = vld [vmem:[%s1742_s1 + $0x4] sm:$0xf]  ;;  %v911_v60 = vmul.f32 %v1459_v13, %v1417_v44 }
  0xa8   :  { %406 = vrot.lane.b32.xlu0 %v399_v61, %s1337_s22  ;;  %404 = vrot.lane.b32.xlu2 %v398_v62, %s1337_s22 }
  0xa9   :  { %408 = vrot.lane.b32.xlu1 %v400_v63, %s1337_s22 }
  0xad   :  { %v464_v1 = vld.sshfl [vmem:[#allocation1] sm:$0xff pattern:$0x75316420]  ;;  %v465_v2 = vld.sshfl [vmem:[#allocation1 + $0x8] sm:$0xff pattern:$0x75316420] }
  0xae   :  { %v466_v3 = vld.sshfl [vmem:[#allocation1 + $0x10] sm:$0xff pattern:$0x75316420]  ;;  %v471_v19 = vpack.c.bf16 %v465_v2, %v465_v2  ;;  %v470_v20 = vpack.c.bf16 %v464_v1, %v464_v1 }
  0xaf   :  { %522 = vst [vmem:[#allocation1] ss:$4 sm:$0xff] %v1369_v4  ;;  %v582_v4 = vmul.f32 %v1445_v7, %v1372_v6  ;;  %v472_v21 = vpack.c.bf16 %v466_v3, %v466_v3  ;;  %v973_v3 = vmul.f32 %v1473_v15, %v1423_v48 }
  0xb0   :  { %334 = vrot.lane.b32.xlu0 %v328_v50, %s1338_s23  ;;  %332 = vrot.lane.b32.xlu2 %v326_v49, %s1338_s23  ;;  %v146_v49 = vsel %vm106_vm10, %v84_v46, 0  ;;  %v143_v50 = vsel %vm106_vm10, %v83_v47, 0  ;;  %v1570_v46 = vld [vmem:[%s1742_s1 + $0x8] sm:$0xf] }
  0xb1   :  { %336 = vrot.lane.b32.xlu1 %v330_v53, %s1338_s23  ;;  %168 = vmatpush.bf16.msra.mxu3 %v146_v49  ;;  %v96_v53 = vpop.permute.xlu0 %95 }
  0xb2   :  { %155 = vmatpush.bf16.msra.mxu2 %v143_v50  ;;  %v100_v18 = vsel %vm99_vm12, %v94_v51, %v96_v53  ;;  %v101_v17 = vsel %vm99_vm12, %v96_v53, %v98_v52 }
  0xb3   :  { %v108_v57 = vsel %vm106_vm10, %v100_v18, 0  ;;  %v111_v58 = vsel %vm106_vm10, %v101_v17, 0  ;;  %v1585_v17 = vld [vmem:[%s1742_s1 + $0x14] sm:$0xf] }
  0xb4   :  { %1243 = vmatmul.msk.bf16.vlgmr.msra.gmra.mxu3 %vm102_vm11, %v1502_v54  ;;  %120 = vmatpush.bf16.msra.mxu0 %v108_v57 }
  0xb5   :  { %1242 = vmatmul.msk.bf16.vlgmr.msra.gmra.mxu2 %vm102_vm11, %v1502_v54  ;;  %133 = vmatpush.bf16.msra.mxu1 %v111_v58 }
  0xb6   :  { %v523_v10 = vld.sshfl [vmem:[#allocation1] sm:$0xff pattern:$0x73625140]  ;;  %v525_v11 = vld.sshfl [vmem:[#allocation1 + $0x8] sm:$0xff pattern:$0x73625140] }
  0xb7   :  { %v527_v12 = vld.sshfl [vmem:[#allocation1 + $0x10] sm:$0xff pattern:$0x73625140]  ;;  %586 = vst [vmem:[#allocation1] ss:$2 sm:$0xff] %v582_v4  ;;  %1240 = vmatmul.msk.bf16.vlgmr.msra.gmra.mxu0 %vm102_vm11, %v1517_v59 }
  0xb8   :  { %588 = vst [vmem:[#allocation1 + $0x10] ss:$2 sm:$0xff] %v583_v8  ;;  %531 = vrot.lane.b32.xlu0 %v525_v11, %s1339_s26  ;;  %529 = vrot.lane.b32.xlu2 %v523_v10, %s1339_s26 }
  0xb9   :  { %533 = vrot.lane.b32.xlu1 %v527_v12, %s1339_s26  ;;  %1241 = vmatmul.msk.bf16.vlgmr.msra.gmra.mxu1 %vm102_vm11, %v1517_v59 }
  0xbe   :  { %v589_v16 = vld.sshfl [vmem:[#allocation1] sm:$0xff pattern:$0x75316420]  ;;  %v590_v6 = vld.sshfl [vmem:[#allocation1 + $0x8] sm:$0xff pattern:$0x75316420] }
  0xbf   :  { %652 = vst [vmem:[#allocation1] ss:$2 sm:$0xff] %v650_v14  ;;  %v591_v22 = vld.sshfl [vmem:[#allocation1 + $0x10] sm:$0xff pattern:$0x75316420]  ;;  %v596_v35 = vpack.c.bf16 %v590_v6, %v590_v6  ;;  %v595_v36 = vpack.c.bf16 %v589_v16, %v589_v16  ;;  %v1083_v6 = vmul.f32 %v1473_v15, %v1438_v5 }
  0xc0   :  { %478 = vrot.lane.b32.xlu0 %v471_v19, %s1340_s0  ;;  %476 = vrot.lane.b32.xlu2 %v470_v20, %s1340_s0  ;;  %v597_v38 = vpack.c.bf16 %v591_v22, %v591_v22  ;;  %v1082_v19 = vmul.f32 %v1459_v13, %v1445_v7 }
  0xc1   :  { %480 = vrot.lane.b32.xlu1 %v472_v21, %s1340_s0 }
  0xc6   :  { %v1467_v23 = vld.sshfl [vmem:[#allocation1] sm:$0xff pattern:$0x75316420]  ;;  %v1469_v26 = vld.sshfl [vmem:[#allocation1 + $0x8] sm:$0xff pattern:$0x75316420] }
  0xc7   :  { %660 = vst [vmem:[#allocation1] ss:$4 sm:$0xff] %v1452_v9 }
  0xce   :  { %v661_v31 = vld.sshfl [vmem:[#allocation1] sm:$0xff pattern:$0x73625140]  ;;  %v663_v32 = vld.sshfl [vmem:[#allocation1 + $0x8] sm:$0xff pattern:$0x73625140] }
  0xcf   :  { %744 = vst [vmem:[#allocation1] ss:$2 sm:$0xff] %v740_v27  ;;  %v665_v33 = vld.sshfl [vmem:[#allocation1 + $0x10] sm:$0xff pattern:$0x73625140]  ;;  %669 = vrot.lane.b32.xlu0 %v663_v32, %s1334_s19  ;;  %667 = vrot.lane.b32.xlu2 %v661_v31, %s1334_s19 }
  0xd0   :  { %671 = vrot.lane.b32.xlu1 %v665_v33, %s1334_s19  ;;  %746 = vst [vmem:[#allocation1 + $0x10] ss:$2 sm:$0xff] %v741_v28 }
  0xd6   :  { %v747_v24 = vld.sshfl [vmem:[#allocation1] sm:$0xff pattern:$0x75316420]  ;;  %v748_v37 = vld.sshfl [vmem:[#allocation1 + $0x8] sm:$0xff pattern:$0x75316420] }
  0xd7   :  { %805 = vst [vmem:[#allocation1] ss:$2 sm:$0xff] %v801_v34  ;;  %603 = vrot.lane.b32.xlu0 %v596_v35, %s1341_s27  ;;  %601 = vrot.lane.b32.xlu2 %v595_v36, %s1341_s27  ;;  %v749_v39 = vld.sshfl [vmem:[#allocation1 + $0x10] sm:$0xff pattern:$0x75316420]  ;;  %v754_v41 = vpack.c.bf16 %v748_v37, %v748_v37  ;;  %v753_v30 = vpack.c.bf16 %v747_v24, %v747_v24 }
  0xd8   :  { %605 = vrot.lane.b32.xlu1 %v597_v38, %s1341_s27  ;;  %807 = vst [vmem:[#allocation1 + $0x10] ss:$2 sm:$0xff] %v802_v25  ;;  %v755_v45 = vpack.c.bf16 %v749_v39, %v749_v39  ;;  %v1554_v38 = vld [vmem:[%s1742_s1 + $0xc] sm:$0xf] }
  0xde   :  { %v808_v42 = vld.sshfl [vmem:[#allocation1] sm:$0xff pattern:$0x75316420]  ;;  %v809_v43 = vld.sshfl [vmem:[#allocation1 + $0x8] sm:$0xff pattern:$0x75316420] }
  0xdf   :  { %761 = vrot.lane.b32.xlu0 %v754_v41, %s1336_s21  ;;  %759 = vrot.lane.b32.xlu2 %v753_v30, %s1336_s21  ;;  %v810_v29 = vld.sshfl [vmem:[#allocation1 + $0x10] sm:$0xff pattern:$0x75316420]  ;;  %v814_v63 = vpack.c.bf16 %v808_v42, %v808_v42  ;;  %v815_v2 = vpack.c.bf16 %v809_v43, %v809_v43 }
  0xe0   :  { %763 = vrot.lane.b32.xlu1 %v755_v45, %s1336_s21  ;;  %862 = vst [vmem:[#allocation1] ss:$4 sm:$0xff] %v1452_v9  ;;  %v816_v44 = vpack.c.bf16 %v810_v29, %v810_v29 }
  0xe7   :  { %v867_v61 = vld.sshfl [vmem:[#allocation1 + $0x10] sm:$0xff pattern:$0x73625140]  ;;  %v863_v40 = vld.sshfl [vmem:[#allocation1] sm:$0xff pattern:$0x73625140] }
  0xe8   :  { %873 = vrot.lane.b32.xlu1 %v867_v61, %s1338_s23  ;;  %v865_v62 = vld.sshfl [vmem:[#allocation1 + $0x8] sm:$0xff pattern:$0x73625140]  ;;  %917 = vst [vmem:[#allocation1 + $0x10] ss:$2 sm:$0xff] %v912_v56  ;;  %869 = vrot.lane.b32.xlu2 %v863_v40, %s1338_s23 }
  0xe9   :  { %915 = vst [vmem:[#allocation1] ss:$2 sm:$0xff] %v911_v60  ;;  %871 = vrot.lane.b32.xlu0 %v865_v62, %s1338_s23  ;;  %v1598_v62 = vld [vmem:[%s1742_s1 + $0x10] sm:$0xf]  ;;  %s1344_s23 = smov [#allocation2]  }
  0xea   :  { %s1222_s24 = sshll.u32 %s1344_s23, 4  ;;  %s1223_s24 = int_to_ptr.vmem [resolvable:$true] %s1222_s24 }
  0xef   :  { %v920_v1 = vld.sshfl [vmem:[#allocation1 + $0x10] sm:$0xff pattern:$0x75316420] }
  0xf0   :  { %v918_v8 = vld.sshfl [vmem:[#allocation1] sm:$0xff pattern:$0x75316420]  ;;  %v919_v4 = vld.sshfl [vmem:[#allocation1 + $0x8] sm:$0xff pattern:$0x75316420]  ;;  %824 = vrot.lane.b32.xlu1 %v816_v44, %s1335_s20  ;;  %820 = vrot.lane.b32.xlu2 %v814_v63, %s1335_s20 }
  0xf1   :  { %976 = vst [vmem:[#allocation1] ss:$2 sm:$0xff] %v972_v0  ;;  %822 = vrot.lane.b32.xlu0 %v815_v2, %s1335_s20  ;;  %v280_v48 = vpop.permute.xlu2 %279  ;;  %v925_v21 = vpack.c.bf16 %v919_v4, %v919_v4  ;;  %v924_v22 = vpack.c.bf16 %v918_v8, %v918_v8  ;;  %v1611_v4 = vld [vmem:[%s1742_s1 + $0x1c] sm:$0xf] }
  0xf2   :  { %978 = vst [vmem:[#allocation1 + $0x10] ss:$2 sm:$0xff] %v973_v3 }
  0xf8   :  { %v979_v10 = vld.sshfl [vmem:[#allocation1] sm:$0xff pattern:$0x75316420]  ;;  %v980_v11 = vld.sshfl [vmem:[#allocation1 + $0x8] sm:$0xff pattern:$0x75316420] }
  0xf9   :  { %v981_v12 = vld.sshfl [vmem:[#allocation1 + $0x10] sm:$0xff pattern:$0x75316420]  ;;  %v986_v14 = vpack.c.bf16 %v980_v11, %v980_v11  ;;  %v985_v55 = vpack.c.bf16 %v979_v10, %v979_v10  ;;  %v208_v31 = vpop.permute.xlu2 %207 }
  0xfa   :  { %1033 = vst [vmem:[#allocation1] ss:$4 sm:$0xff] %v1452_v9  ;;  %v987_v16 = vpack.c.bf16 %v981_v12, %v981_v12  ;;  %v926_v9 = vpack.c.bf16 %v920_v1, %v920_v1 }
  0xfb   :  { %993 = vrot.lane.b32.xlu0 %v986_v14, %s1340_s0  ;;  %991 = vrot.lane.b32.xlu2 %v985_v55, %s1340_s0 }
  0xfc   :  { %995 = vrot.lane.b32.xlu1 %v987_v16, %s1340_s0  ;;  %s1345_s0 = smov 256  }
 0x101   :  { %v1038_v20 = vld.sshfl [vmem:[#allocation1 + $0x10] sm:$0xff pattern:$0x73625140]  ;;  %v1034_v27 = vld.sshfl [vmem:[#allocation1] sm:$0xff pattern:$0x73625140] }
 0x102   :  { %1088 = vst [vmem:[#allocation1 + $0x10] ss:$2 sm:$0xff] %v1083_v6  ;;  %v1036_v28 = vld.sshfl [vmem:[#allocation1 + $0x8] sm:$0xff pattern:$0x73625140]  ;;  %v405_v42 = vpop.permute.xlu2 %404 }
 0x103   :  { %932 = vrot.lane.b32.xlu0 %v925_v21, %s1337_s22  ;;  %930 = vrot.lane.b32.xlu2 %v924_v22, %s1337_s22  ;;  %1086 = vst [vmem:[#allocation1] ss:$2 sm:$0xff] %v1082_v19  ;;  %v1624_v6 = vld [vmem:[%s1742_s1 + $0x18] sm:$0xf] }
 0x104   :  { %934 = vrot.lane.b32.xlu1 %v926_v9, %s1337_s22 }
 0x109   :  { %v1091_v5 = vld.sshfl [vmem:[#allocation1 + $0x10] sm:$0xff pattern:$0x75316420]  ;;  %v282_v15 = vpop.permute.xlu0 %281 }
 0x10a   :  { %v1097_v32 = vpack.c.bf16 %v1091_v5, %v1091_v5  ;;  %v1090_v7 = vld.sshfl [vmem:[#allocation1 + $0x8] sm:$0xff pattern:$0x75316420]  ;;  %v1089_v13 = vld.sshfl [vmem:[#allocation1] sm:$0xff pattern:$0x75316420]  ;;  %v284_v33 = vpop.permute.xlu1 %283  ;;  %v286_v34 = vsel %vm285_vm13, %v280_v48, %v282_v15  ;;  %v333_v53 = vpop.permute.xlu2 %332  ;;  %v657_v5 = vpack.c.bf16 %v1467_v23, %v1467_v23 }
 0x10b   :  { %v1096_v35 = vpack.c.bf16 %v1090_v7, %v1090_v7  ;;  %v1095_v36 = vpack.c.bf16 %v1089_v13, %v1089_v13  ;;  %v292_v25 = vsel %vm106_vm10, %v286_v34, 0  ;;  %v287_v24 = vsel %vm285_vm13, %v282_v15, %v284_v33 }
 0x10c   :  { %1105 = vrot.lane.b32.xlu1 %v1097_v32, %s1341_s27  ;;  %304 = vmatpush.bf16.msrb.mxu2 %v292_v25  ;;  %v295_v37 = vsel %vm106_vm10, %v287_v24, 0  ;;  %v658_v15 = vpack.c.bf16 %v1469_v26, %v1469_v26  ;;  %v708_v33 = vsel %vm106_vm10, %v657_v5, 0  ;;  %v1651_v26 = vld [vmem:[%s1742_s1 + $0x20] sm:$0xf] }
 0x10d   :  { %1103 = vrot.lane.b32.xlu0 %v1096_v35, %s1341_s27  ;;  %1101 = vrot.lane.b32.xlu2 %v1095_v36, %s1341_s27 }
 0x10e   :  { %317 = vmatpush.bf16.msrb.mxu3 %v295_v37  ;;  %v711_v35 = vsel %vm106_vm10, %v658_v15, 0 }
 0x10f   :  { %1246 = vmatmul.msk.bf16.vlgmr.msrb.gmra.mxu2 %vm102_vm11, %v1554_v38 }
 0x111   :  { %v210_v39 = vpop.permute.xlu0 %209  ;;  %1247 = vmatmul.msk.bf16.vlgmr.msrb.gmra.mxu3 %vm102_vm11, %v1554_v38 }
 0x112   :  { %v212_v41 = vpop.permute.xlu1 %211  ;;  %v214_v30 = vsel %vm213_vm14, %v208_v31, %v210_v39  ;;  %v530_v44 = vpop.permute.xlu2 %529 }
 0x113   :  { %v220_v43 = vsel %vm106_vm10, %v214_v30, 0  ;;  %v215_v45 = vsel %vm213_vm14, %v210_v39, %v212_v41 }
 0x114   :  { %1044 = vrot.lane.b32.xlu1 %v1038_v20, %s1339_s26  ;;  %232 = vmatpush.bf16.msrb.mxu0 %v220_v43  ;;  %v223_v29 = vsel %vm106_vm10, %v215_v45, 0 }
 0x115   :  { %1042 = vrot.lane.b32.xlu0 %v1036_v28, %s1339_s26  ;;  %1040 = vrot.lane.b32.xlu2 %v1034_v27, %s1339_s26  ;;  %s1224_s26 = sshll.u32 %s1744_s3, 4  ;;  %s1225_s26 = int_to_ptr.hbm [resolvable:$true] %s1224_s26 }
 0x116   :  { %245 = vmatpush.bf16.msrb.mxu1 %v223_v29 }
 0x117   :  { %1244 = vmatmul.msk.bf16.vlgmr.msrb.gmra.mxu0 %vm102_vm11, %v1570_v46 }
 0x119   :  { %1245 = vmatmul.msk.bf16.vlgmr.msrb.gmra.mxu1 %vm102_vm11, %v1570_v46 }
 0x11a   :  { %v407_v47 = vpop.permute.xlu0 %406  ;;  %v477_v10 = vpop.permute.xlu2 %476 }
 0x11b   :  { %v409_v49 = vpop.permute.xlu1 %408  ;;  %v411_v50 = vsel %vm410_vm15, %v405_v42, %v407_v47 }
 0x11c   :  { %v412_v51 = vsel %vm410_vm15, %v407_v47, %v409_v49  ;;  %v417_v52 = vsel %vm106_vm10, %v411_v50, 0 }
 0x11d   :  { %v420_v18 = vsel %vm106_vm10, %v412_v51, 0  ;;  %429 = vmatpush.bf16.msra.mxu2 %v417_v52 }
 0x11e   :  { %442 = vmatpush.bf16.msra.mxu3 %v420_v18 }
 0x120   :  { %1250 = vmatmul.msk.bf16.vlgmr.msra.gmra.mxu2 %vm102_vm11, %v1585_v17 }
 0x121   :  { %1251 = vmatmul.msk.bf16.vlgmr.msra.gmra.mxu3 %vm102_vm11, %v1585_v17 }
 0x122   :  { %v335_v56 = vpop.permute.xlu0 %334 }
 0x123   :  { %v337_v57 = vpop.permute.xlu1 %336  ;;  %v339_v58 = vsel %vm338_vm0, %v333_v53, %v335_v56 }
 0x124   :  { %v340_v60 = vsel %vm338_vm0, %v335_v56, %v337_v57  ;;  %v345_v61 = vsel %vm106_vm10, %v339_v58, 0 }
 0x125   :  { %v348_v40 = vsel %vm106_vm10, %v340_v60, 0  ;;  %357 = vmatpush.bf16.msra.mxu0 %v345_v61 }
 0x126   :  { %370 = vmatpush.bf16.msra.mxu1 %v348_v40 }
 0x128   :  { %1248 = vmatmul.msk.bf16.vlgmr.msra.gmra.mxu0 %vm102_vm11, %v1598_v62 }
 0x129   :  { %1249 = vmatmul.msk.bf16.vlgmr.msra.gmra.mxu1 %vm102_vm11, %v1598_v62  ;;  %v668_v19 = vpop.permute.xlu2 %667 }
 0x12a   :  { %v532_v63 = vpop.permute.xlu0 %531 }
 0x12b   :  { %v534_v0 = vpop.permute.xlu1 %533  ;;  %v536_v1 = vsel %vm535_vm1, %v530_v44, %v532_v63 }
 0x12c   :  { %v537_v2 = vsel %vm535_vm1, %v532_v63, %v534_v0  ;;  %v542_v3 = vsel %vm106_vm10, %v536_v1, 0 }
 0x12d   :  { %v545_v8 = vsel %vm106_vm10, %v537_v2, 0  ;;  %554 = vmatpush.bf16.msrb.mxu2 %v542_v3 }
 0x12e   :  { %567 = vmatpush.bf16.msrb.mxu3 %v545_v8 }
 0x130   :  { %1254 = vmatmul.msk.bf16.vlgmr.msrb.gmra.mxu2 %vm102_vm11, %v1611_v4 }
 0x131   :  { %1255 = vmatmul.msk.bf16.vlgmr.msrb.gmra.mxu3 %vm102_vm11, %v1611_v4  ;;  %v602_v27 = vpop.permute.xlu2 %601 }
 0x132   :  { %v479_v11 = vpop.permute.xlu0 %478 }
 0x133   :  { %v481_v12 = vpop.permute.xlu1 %480  ;;  %v483_v14 = vsel %vm482_vm2, %v477_v10, %v479_v11 }
 0x134   :  { %v484_v55 = vsel %vm482_vm2, %v479_v11, %v481_v12  ;;  %v489_v16 = vsel %vm106_vm10, %v483_v14, 0 }
 0x135   :  { %v492_v48 = vsel %vm106_vm10, %v484_v55, 0  ;;  %501 = vmatpush.bf16.msrb.mxu0 %v489_v16 }
 0x136   :  { %514 = vmatpush.bf16.msrb.mxu1 %v492_v48  ;;  %v135_v58 = vpop.f32.mrf.mxu1 }
 0x137   :  { %v170_v40 = vpop.f32.mrf.mxu3 }
 0x138   :  { %1252 = vmatmul.msk.bf16.vlgmr.msrb.gmra.mxu0 %vm102_vm11, %v1624_v6  ;;  %v157_v61 = vpop.f32.mrf.mxu2  ;;  %v1683_v63 = vadd.f32 %v170_v40, %v135_v58 }
 0x139   :  { %1253 = vmatmul.msk.bf16.vlgmr.msrb.gmra.mxu1 %vm102_vm11, %v1624_v6 }
 0x13e   :  { %v137_v11 = vpop.f32.mrf.mxu1 }
 0x13f   :  { %v172_v14 = vpop.f32.mrf.mxu3 }
 0x140   :  { %v159_v12 = vpop.f32.mrf.mxu2 }
 0x141   :  { %v670_v20 = vpop.permute.xlu0 %669 }
 0x142   :  { %v672_v21 = vpop.permute.xlu1 %671  ;;  %v673_v22 = vsel %vm99_vm12, %v668_v19, %v670_v20 }
 0x143   :  { %v674_v9 = vsel %vm99_vm12, %v670_v20, %v672_v21  ;;  %v676_v28 = vsel %vm106_vm10, %v673_v22, 0 }
 0x144   :  { %v679_v31 = vsel %vm106_vm10, %v674_v9, 0  ;;  %688 = vmatpush.bf16.msra.mxu2 %v676_v28 }
 0x145   :  { %701 = vmatpush.bf16.msra.mxu3 %v679_v31 }
 0x147   :  { %1259 = vmatmul.msk.bf16.vlgmr.msra.gmra.mxu2 %vm102_vm11, %v1517_v59 }
 0x148   :  { %1260 = vmatmul.msk.bf16.vlgmr.msra.gmra.mxu3 %vm102_vm11, %v1517_v59  ;;  %v760_v59 = vpop.permute.xlu2 %759 }
 0x149   :  { %v604_v32 = vpop.permute.xlu0 %603 }
 0x14a   :  { %v606_v7 = vpop.permute.xlu1 %605  ;;  %v608_v13 = vsel %vm607_vm3, %v602_v27, %v604_v32 }
 0x14b   :  { %v609_v34 = vsel %vm607_vm3, %v604_v32, %v606_v7  ;;  %v614_v23 = vsel %vm106_vm10, %v608_v13, 0 }
 0x14c   :  { %v617_v36 = vsel %vm106_vm10, %v609_v34, 0  ;;  %626 = vmatpush.bf16.msra.mxu0 %v614_v23 }
 0x14d   :  { %639 = vmatpush.bf16.msra.mxu1 %v617_v36 }
 0x14f   :  { %1256 = vmatmul.msk.bf16.vlgmr.msra.gmra.mxu0 %vm102_vm11, %v1651_v26 }
 0x150   :  { %720 = vmatpush.bf16.msrb.mxu0 %v708_v33  ;;  %1257 = vmatmul.msk.bf16.vlgmr.msra.gmra.mxu1 %vm102_vm11, %v1651_v26  ;;  %v870_v42 = vpop.permute.xlu2 %869 }
 0x151   :  { %733 = vmatpush.bf16.msrb.mxu1 %v711_v35  ;;  %v762_v25 = vpop.permute.xlu0 %761 }
 0x152   :  { %v764_v24 = vpop.permute.xlu1 %763  ;;  %v765_v37 = vsel %vm213_vm14, %v760_v59, %v762_v25 }
 0x153   :  { %v766_v39 = vsel %vm213_vm14, %v762_v25, %v764_v24  ;;  %v768_v41 = vsel %vm106_vm10, %v765_v37, 0 }
 0x154   :  { %v771_v30 = vsel %vm106_vm10, %v766_v39, 0  ;;  %780 = vmatpush.bf16.msrb.mxu2 %v768_v41 }
 0x155   :  { %793 = vmatpush.bf16.msrb.mxu3 %v771_v30 }
 0x157   :  { %1263 = vmatmul.msk.bf16.vlgmr.msrb.gmra.mxu2 %vm102_vm11, %v1570_v46 }
 0x158   :  { %1264 = vmatmul.msk.bf16.vlgmr.msrb.gmra.mxu3 %vm102_vm11, %v1570_v46  ;;  %v821_v51 = vpop.permute.xlu2 %820 }
 0x15a   :  { %v874_v43 = vpop.permute.xlu1 %873 }
 0x15b   :  { %v872_v45 = vpop.permute.xlu0 %871 }
 0x15c   :  { %v875_v29 = vsel %vm338_vm0, %v870_v42, %v872_v45  ;;  %v876_v47 = vsel %vm338_vm0, %v872_v45, %v874_v43 }
 0x15d   :  { %v878_v49 = vsel %vm106_vm10, %v875_v29, 0  ;;  %v881_v50 = vsel %vm106_vm10, %v876_v47, 0 }
 0x15e   :  { %890 = vmatpush.bf16.msra.mxu2 %v878_v49  ;;  %903 = vmatpush.bf16.msra.mxu3 %v881_v50 }
 0x15f   :  { %1261 = vmatmul.msk.bf16.vlgmr.msrb.gmra.mxu0 %vm102_vm11, %v1502_v54 }
 0x160   :  { %1262 = vmatmul.msk.bf16.vlgmr.msrb.gmra.mxu1 %vm102_vm11, %v1502_v54  ;;  %v122_v54 = vpop.f32.mrf.mxu0  ;;  %v992_v60 = vpop.permute.xlu2 %991 }
 0x161   :  { %v1681_v44 = vadd.f32 %v157_v61, %v122_v54 }
 0x162   :  { %v825_v46 = vpop.permute.xlu1 %824 }
 0x163   :  { %v823_v52 = vpop.permute.xlu0 %822 }
 0x164   :  { %v826_v53 = vsel %vm285_vm13, %v821_v51, %v823_v52  ;;  %v827_v18 = vsel %vm285_vm13, %v823_v52, %v825_v46 }
 0x165   :  { %v829_v56 = vsel %vm106_vm10, %v826_v53, 0  ;;  %v832_v57 = vsel %vm106_vm10, %v827_v18, 0 }
 0x166   :  { %841 = vmatpush.bf16.msra.mxu0 %v829_v56  ;;  %854 = vmatpush.bf16.msra.mxu1 %v832_v57 }
 0x167   :  { %1267 = vmatmul.msk.bf16.vlgmr.msra.gmra.mxu2 %vm102_vm11, %v1598_v62 }
 0x168   :  { %1268 = vmatmul.msk.bf16.vlgmr.msra.gmra.mxu3 %vm102_vm11, %v1598_v62  ;;  %v124_v10 = vpop.f32.mrf.mxu0  ;;  %v931_v55 = vpop.permute.xlu2 %930 }
 0x16d   :  { %v994_v0 = vpop.permute.xlu0 %993 }
 0x16e   :  { %v996_v1 = vpop.permute.xlu1 %995  ;;  %v997_v2 = vsel %vm482_vm2, %v992_v60, %v994_v0 }
 0x16f   :  { %v998_v3 = vsel %vm482_vm2, %v994_v0, %v996_v1  ;;  %v1000_v8 = vsel %vm106_vm10, %v997_v2, 0  ;;  %1265 = vmatmul.msk.bf16.vlgmr.msra.gmra.mxu0 %vm102_vm11, %v1554_v38 }
 0x170   :  { %v1003_v62 = vsel %vm106_vm10, %v998_v3, 0  ;;  %1012 = vmatpush.bf16.msrb.mxu2 %v1000_v8  ;;  %1266 = vmatmul.msk.bf16.vlgmr.msra.gmra.mxu1 %vm102_vm11, %v1554_v38  ;;  %v1102_v38 = vpop.permute.xlu2 %1101 }
 0x171   :  { %1025 = vmatpush.bf16.msrb.mxu3 %v1003_v62 }
 0x175   :  { %v933_v16 = vpop.permute.xlu0 %932 }
 0x176   :  { %v935_v48 = vpop.permute.xlu1 %934  ;;  %v936_v19 = vsel %vm410_vm15, %v931_v55, %v933_v16 }
 0x177   :  { %v937_v20 = vsel %vm410_vm15, %v933_v16, %v935_v48  ;;  %v939_v21 = vsel %vm106_vm10, %v936_v19, 0  ;;  %1271 = vmatmul.msk.bf16.vlgmr.msrb.gmra.mxu2 %vm102_vm11, %v1624_v6 }
 0x178   :  { %v942_v22 = vsel %vm106_vm10, %v937_v20, 0  ;;  %951 = vmatpush.bf16.msrb.mxu0 %v939_v21  ;;  %1272 = vmatmul.msk.bf16.vlgmr.msrb.gmra.mxu3 %vm102_vm11, %v1624_v6  ;;  %v1041_v32 = vpop.permute.xlu2 %1040 }
 0x179   :  { %964 = vmatpush.bf16.msrb.mxu1 %v942_v22 }
 0x17e   :  { %v1106_v27 = vpop.permute.xlu1 %1105 }
 0x17f   :  { %v1104_v9 = vpop.permute.xlu0 %1103  ;;  %1269 = vmatmul.msk.bf16.vlgmr.msrb.gmra.mxu0 %vm102_vm11, %v1585_v17 }
 0x180   :  { %v1107_v28 = vsel %vm607_vm3, %v1102_v38, %v1104_v9  ;;  %v1108_v31 = vsel %vm607_vm3, %v1104_v9, %v1106_v27  ;;  %1270 = vmatmul.msk.bf16.vlgmr.msrb.gmra.mxu1 %vm102_vm11, %v1585_v17 }
 0x181   :  { %v1110_v5 = vsel %vm106_vm10, %v1107_v28, 0  ;;  %v1113_v15 = vsel %vm106_vm10, %v1108_v31, 0 }
 0x182   :  { %1122 = vmatpush.bf16.msra.mxu2 %v1110_v5  ;;  %1135 = vmatpush.bf16.msra.mxu3 %v1113_v15 }
 0x186   :  { %v1045_v6 = vpop.permute.xlu1 %1044 }
 0x187   :  { %v1043_v7 = vpop.permute.xlu0 %1042  ;;  %1275 = vmatmul.msk.bf16.vlgmr.msra.gmra.mxu2 %vm102_vm11, %v1651_v26 }
 0x188   :  { %v1046_v13 = vsel %vm535_vm1, %v1041_v32, %v1043_v7  ;;  %v1047_v33 = vsel %vm535_vm1, %v1043_v7, %v1045_v6  ;;  %1276 = vmatmul.msk.bf16.vlgmr.msra.gmra.mxu3 %vm102_vm11, %v1651_v26 }
 0x189   :  { %v1049_v17 = vsel %vm106_vm10, %v1046_v13, 0  ;;  %v1052_v34 = vsel %vm106_vm10, %v1047_v33, 0 }
 0x18a   :  { %1061 = vmatpush.bf16.msra.mxu0 %v1049_v17  ;;  %1074 = vmatpush.bf16.msra.mxu1 %v1052_v34 }
 0x18f   :  { %1273 = vmatmul.msk.bf16.vlgmr.msra.gmra.mxu0 %vm102_vm11, %v1611_v4 }
 0x190   :  { %1274 = vmatmul.msk.bf16.vlgmr.msra.gmra.mxu1 %vm102_vm11, %v1611_v4 }
 0x192   :  { %v306_v23 = vpop.f32.mrf.mxu2 }
 0x194   :  { %v234_v35 = vpop.f32.mrf.mxu0  ;;  %v319_v36 = vpop.f32.mrf.mxu3 }
 0x195   :  { %v251_v46 = vadd.f32 %v234_v35, %v1681_v44 }
 0x196   :  { %v247_v59 = vpop.f32.mrf.mxu1 }
 0x197   :  { %v252_v53 = vadd.f32 %v247_v59, %v1683_v63  ;;  %v323_v54 = vadd.f32 %v306_v23, %v251_v46 }
 0x199   :  { %v324_v58 = vadd.f32 %v319_v36, %v252_v53 }
 0x19a   :  { %v308_v25 = vpop.f32.mrf.mxu2 }
 0x19c   :  { %v236_v24 = vpop.f32.mrf.mxu0  ;;  %v321_v37 = vpop.f32.mrf.mxu3 }
 0x19e   :  { %v249_v26 = vpop.f32.mrf.mxu1 }
 0x1a3   :  { %v431_v39 = vpop.f32.mrf.mxu2 }
 0x1a4   :  { %v444_v41 = vpop.f32.mrf.mxu3 }
 0x1a5   :  { %v359_v30 = vpop.f32.mrf.mxu0 }
 0x1a6   :  { %v372_v42 = vpop.f32.mrf.mxu1  ;;  %v376_v60 = vadd.f32 %v359_v30, %v323_v54 }
 0x1a7   :  { %v377_v61 = vadd.f32 %v372_v42, %v324_v58 }
 0x1a8   :  { %v448_v40 = vadd.f32 %v431_v39, %v376_v60 }
 0x1a9   :  { %v449_v0 = vadd.f32 %v444_v41, %v377_v61 }
 0x1ab   :  { %v433_v43 = vpop.f32.mrf.mxu2 }
 0x1ac   :  { %v446_v45 = vpop.f32.mrf.mxu3 }
 0x1ad   :  { %v361_v29 = vpop.f32.mrf.mxu0 }
 0x1ae   :  { %v374_v47 = vpop.f32.mrf.mxu1 }
 0x1b3   :  { %v556_v49 = vpop.f32.mrf.mxu2 }
 0x1b4   :  { %v569_v50 = vpop.f32.mrf.mxu3 }
 0x1b5   :  { %v503_v51 = vpop.f32.mrf.mxu0 }
 0x1b6   :  { %v516_v4 = vpop.f32.mrf.mxu1  ;;  %v520_v1 = vadd.f32 %v503_v51, %v448_v40 }
 0x1b7   :  { %v521_v2 = vadd.f32 %v516_v4, %v449_v0 }
 0x1b8   :  { %v573_v8 = vadd.f32 %v556_v49, %v520_v1  ;;  %v1342_v1 = vmov 512.0  }
 0x1b9   :  { %v574_v10 = vadd.f32 %v569_v50, %v521_v2  ;;  %1298 = vrcp.f32 %v1342_v1 }
 0x1bb   :  { %v558_v52 = vpop.f32.mrf.mxu2 }
 0x1bc   :  { %v571_v18 = vpop.f32.mrf.mxu3 }
 0x1bd   :  { %v505_v56 = vpop.f32.mrf.mxu0 }
 0x1be   :  { %v518_v57 = vpop.f32.mrf.mxu1 }
 0x1bf   :  { %v1299_v2 = vpop.eup %1298 }
 0x1c0   :  { %vm1156_vm4 = vweird.f32 %v1299_v2 }
 0x1ca   :  { %v690_v3 = vpop.f32.mrf.mxu2 }
 0x1cb   :  { %v703_v62 = vpop.f32.mrf.mxu3 }
 0x1cc   :  { %v628_v11 = vpop.f32.mrf.mxu0 }
 0x1cd   :  { %v1723_v44 = vadd.f32 %v628_v11, %v573_v8  ;;  %v641_v12 = vpop.f32.mrf.mxu1 }
 0x1ce   :  { %v1725_v63 = vadd.f32 %v641_v12, %v574_v10 }
 0x1d0   :  { %v1143_v14 = vadd.f32 %v1725_v63, %v1723_v44 }
 0x1d2   :  { %1144 = vadd.xlane.f32.xlu2 %v1143_v14  ;;  %v692_v55 = vpop.f32.mrf.mxu2 }
 0x1d3   :  { %v705_v16 = vpop.f32.mrf.mxu3 }
 0x1d4   :  { %v630_v48 = vpop.f32.mrf.mxu0 }
 0x1d5   :  { %v643_v19 = vpop.f32.mrf.mxu1 }
 0x1da   :  { %v782_v20 = vpop.f32.mrf.mxu2 }
 0x1db   :  { %v795_v21 = vpop.f32.mrf.mxu3 }
 0x1dc   :  { %v722_v22 = vpop.f32.mrf.mxu0 }
 0x1dd   :  { %v735_v38 = vpop.f32.mrf.mxu1  ;;  %v723_v23 = vadd.f32 %v722_v22, %v690_v3  ;;  %v1152_v3 = vmul.f32 512.0, %v1299_v2 }
 0x1de   :  { %v736_v36 = vadd.f32 %v735_v38, %v703_v62 }
 0x1df   :  { %v799_v24 = vadd.f32 %v782_v20, %v723_v23  ;;  %v1153_v8 = vsub.f32 1.0, %v1152_v3 }
 0x1e0   :  { %v800_v37 = vadd.f32 %v795_v21, %v736_v36 }
 0x1e1   :  { %v1154_v62 = vmul.f32 %v1299_v2, %v1153_v8 }
 0x1e2   :  { %v784_v27 = vpop.f32.mrf.mxu2 }
 0x1e3   :  { %v797_v9 = vpop.f32.mrf.mxu3  ;;  %v1155_v10 = vadd.f32 %v1299_v2, %v1154_v62 }
 0x1e4   :  { %v724_v28 = vpop.f32.mrf.mxu0 }
 0x1e5   :  { %v737_v31 = vpop.f32.mrf.mxu1  ;;  %v1157_v12 = vsel %vm1156_vm4, %v1299_v2, %v1155_v10 }
 0x1ea   :  { %v892_v5 = vpop.f32.mrf.mxu2 }
 0x1eb   :  { %v905_v15 = vpop.f32.mrf.mxu3 }
 0x1ec   :  { %v843_v6 = vpop.f32.mrf.mxu0 }
 0x1ed   :  { %v856_v32 = vpop.f32.mrf.mxu1  ;;  %v860_v26 = vadd.f32 %v843_v6, %v799_v24 }
 0x1ee   :  { %v861_v39 = vadd.f32 %v856_v32, %v800_v37 }
 0x1ef   :  { %v909_v43 = vadd.f32 %v892_v5, %v860_v26  ;;  %v1343_v5 = vmov 0  }
 0x1f0   :  { %v910_v29 = vadd.f32 %v905_v15, %v861_v39  ;;  %1297 = vset.pattern.permute.xlu0 %v1343_v5  ;;  %v1277_v15 = vld [vmem:[%s1743_s2 + $0x8] sm:$0xff]  ;;  %1296 = vset.pattern.permute.xlu2 %v1343_v5 }
 0x1f2   :  { %v894_v7 = vpop.f32.mrf.mxu2 }
 0x1f3   :  { %v907_v13 = vpop.f32.mrf.mxu3 }
 0x1f4   :  { %v845_v33 = vpop.f32.mrf.mxu0 }
 0x1f5   :  { %v858_v17 = vpop.f32.mrf.mxu1 }
 0x1fa   :  { %v1014_v34 = vpop.f32.mrf.mxu2 }
 0x1fb   :  { %v1027_v35 = vpop.f32.mrf.mxu3 }
 0x1fc   :  { %v953_v59 = vpop.f32.mrf.mxu0 }
 0x1fd   :  { %v966_v25 = vpop.f32.mrf.mxu1  ;;  %v970_v47 = vadd.f32 %v953_v59, %v909_v43 }
 0x1fe   :  { %v971_v49 = vadd.f32 %v966_v25, %v910_v29 }
 0x1ff   :  { %v1031_v51 = vadd.f32 %v1014_v34, %v970_v47 }
 0x200   :  { %v1032_v46 = vadd.f32 %v1027_v35, %v971_v49  ;;  %v1176_v35 = vld [vmem:[%s1743_s2] sm:$0xff] }
 0x202   :  { %v1016_v41 = vpop.f32.mrf.mxu2 }
 0x203   :  { %v1029_v30 = vpop.f32.mrf.mxu3 }
 0x204   :  { %v955_v42 = vpop.f32.mrf.mxu0 }
 0x205   :  { %v968_v45 = vpop.f32.mrf.mxu1 }
 0x20a   :  { %v1124_v50 = vpop.f32.mrf.mxu2 }
 0x20b   :  { %v1137_v4 = vpop.f32.mrf.mxu3 }
 0x20c   :  { %v1063_v52 = vpop.f32.mrf.mxu0 }
 0x20d   :  { %v1080_v53 = vadd.f32 %v1063_v52, %v1031_v51  ;;  %v1076_v18 = vpop.f32.mrf.mxu1 }
 0x20e   :  { %v1081_v56 = vadd.f32 %v1076_v18, %v1032_v46 }
 0x20f   :  { %v1141_v57 = vadd.f32 %v1124_v50, %v1080_v53 }
 0x210   :  { %v1142_v54 = vadd.f32 %v1137_v4, %v1081_v56 }
 0x212   :  { %v1147_v58 = vadd.f32 %v1142_v54, %v1141_v57  ;;  %v1126_v60 = vpop.f32.mrf.mxu2 }
 0x213   :  { %v1139_v61 = vpop.f32.mrf.mxu3 }
 0x214   :  { %1148 = vadd.xlane.f32.xlu0 %v1147_v58  ;;  %v1065_v40 = vpop.f32.mrf.mxu0 }
 0x215   :  { %v1078_v0 = vpop.f32.mrf.mxu1 }
 0x228   :  { %1200 = vperm.xlu0 %1297, %v1277_v15  }
 0x245   :  { %v1145_v11 = vpop.xlane.xlu2 %1144 }
 0x287   :  { %v1149_v14 = vpop.xlane.xlu0 %1148 }
 0x288   :  { %v1150_v55 = vadd.f32 %v1149_v14, %v1145_v11 }
 0x28a   :  { %v1158_v16 = vmul.f32 %v1157_v12, %v1150_v55 }
 0x28c   :  { %v1167_v48 = vsub.f32 %v1141_v57, %v1158_v16  ;;  %v1168_v19 = vsub.f32 %v1142_v54, %v1158_v16  ;;  %v1159_v20 = vsub.f32 %v1723_v44, %v1158_v16  ;;  %v1160_v21 = vsub.f32 %v1725_v63, %v1158_v16 }
 0x28e   :  { %v1169_v22 = vmul.f32 %v1167_v48, %v1167_v48  ;;  %v1170_v38 = vmul.f32 %v1168_v19, %v1168_v19  ;;  %v1161_v27 = vmul.f32 %v1159_v20, %v1159_v20  ;;  %v1162_v9 = vmul.f32 %v1160_v21, %v1160_v21 }
 0x290   :  { %v1171_v28 = vadd.f32 %v1170_v38, %v1169_v22  ;;  %v1163_v31 = vadd.f32 %v1162_v9, %v1161_v27 }
 0x292   :  { %1172 = vadd.xlane.f32.xlu2 %v1171_v28  ;;  %1164 = vadd.xlane.f32.xlu1 %v1163_v31 }
 0x29a   :  { %v1201_v37 = vpop.permute.xlu0 %1200 }
 0x305   :  { %v1173_v6 = vpop.xlane.xlu2 %1172  ;;  %v1165_v44 = vpop.xlane.xlu1 %1164 }
 0x306   :  { %v1174_v32 = vadd.f32 %v1173_v6, %v1165_v44 }
 0x308   :  { %v1175_v63 = vmul.f32 %v1174_v32, %v1157_v12 }
 0x30a   :  { %v1177_v7 = vadd.f32 1e-05, %v1175_v63 }
 0x30c   :  { %1300 = vrsqrt.f32 %v1177_v7  ;;  %vm1184_vm6 = vweird.f32 %v1177_v7 }
 0x312   :  { %v1301_v13 = vpop.eup %1300 }
 0x313   :  { %v1179_v33 = vmul.f32 %v1301_v13, %v1177_v7  ;;  %vm1185_vm5 = vweird.f32 %v1301_v13 }
 0x314   :  { %vm1186_vm7 = vmor %vm1184_vm6, %vm1185_vm5 }
 0x315   :  { %v1180_v17 = vmul.f32 %v1301_v13, %v1179_v33 }
 0x317   :  { %v1181_v34 = vmul.f32 0.5, %v1180_v17 }
 0x319   :  { %v1182_v23 = vsub.f32 1.5, %v1181_v34 }
 0x31b   :  { %v1183_v36 = vmul.f32 %v1301_v13, %v1182_v23 }
 0x31d   :  { %v1187_v59 = vsel %vm1186_vm7, %v1301_v13, %v1183_v36 }
 0x31e   :  { %v1188_v25 = vmul.f32 %v1187_v59, %v1176_v35 }
 0x320   :  { %1193 = vperm.xlu2 %1296, %v1188_v25  }
 0x37a   :  { %v1194_v24 = vpop.permute.xlu2 %1193 }
 0x37b   :  { %v1196_v26 = vmul.f32 %v1194_v24, %v1159_v20  ;;  %v1197_v39 = vmul.f32 %v1194_v24, %v1160_v21  ;;  %v1209_v41 = vmul.f32 %v1194_v24, %v1167_v48  ;;  %v1210_v30 = vmul.f32 %v1194_v24, %v1168_v19 }
 0x37d   :  { %v1203_v42 = vadd.f32 %v1201_v37, %v1196_v26  ;;  %v1204_v43 = vadd.f32 %v1201_v37, %v1197_v39  ;;  %v1211_v45 = vadd.f32 %v1209_v41, %v1201_v37  ;;  %v1212_v29 = vadd.f32 %v1210_v30, %v1201_v37 }
 0x37f   :  { %v1205_v47 = vmax.f32 %v1203_v42, 0.0  ;;  %v1206_v49 = vmax.f32 %v1204_v43, 0.0  ;;  %v1213_v50 = vmax.f32 %v1211_v45, 0.0  ;;  %v1214_v51 = vmax.f32 %v1212_v29, 0.0 }
 0x381   :  { %1207 = vst [vmem:[#allocation2] sm:$0xff] %v1205_v47 }
 0x382   :  { %1208 = vst [vmem:[#allocation2 + $0x8] sm:$0xff] %v1206_v49 }
 0x383   :  { %1216 = vst [vmem:[#allocation2 + $0x10] sm:$0xff] %v1213_v50 }
 0x384   :  { %1217 = vst [vmem:[#allocation2 + $0x18] sm:$0xff] %v1214_v51 }
 0x385   :  { %1230 = dma.vmem_to_hbm [thread:$0]  %s1223_s24, 512, %s1225_s26, [#allocation3], %s1345_s0, %s1345_s0, %s1332_s17  }
 0x386   :  { %1326 = dma.done.wait [#allocation3], 512  }
 0x387   :  { %1327 = vsyncadd [#allocation3], 4294966784 }
 0x388   :  { %1235 = vsyncpa [#allocation3], 1 }

</bundles_post_ra>
